<compile_context>
chip_gen: v6e
topology: v6e:2x2x1
jax: 0.10.0
libtpu: 0.0.40
codegen_flags: <defaults>
</compile_context>

<pallas_src>
import functools

import jax
import jax.numpy as jnp
from jax import lax
from jax.experimental import pallas as pl
from jax.experimental.pallas import tpu as pltpu

LANE = 128

# Working-set budget sized for v7x's 64 MiB physical VMEM (headroom left for the
# compiler); automatically comfortable on v5e/v6e (128 MiB).  The explicit limit
# also raises v5e's 16 MiB / v6e's 32 MiB default scoped-VMEM ceilings.
_VMEM_TILE_BUDGET = 48 * 1024 * 1024
_VMEM_LIMIT_BYTES = 56 * 1024 * 1024


def _round_up(x, m):
    return ((x + m - 1) // m) * m


def _step_vmem_bytes(bb, seq, embed, f, f_seg, tv, out_bytes):
    """Approximate per-grid-step VMEM bill (tiles x buffer counts + live temps)."""
    rows = bb * seq
    b = 0
    b += 2 * rows * embed * 2            # x block (bf16), double-buffered
    b += rows * 3 * f_seg * 4            # fused qkv activations (f32)
    b += rows * seq * 4                  # one head's score tile (f32, reused per head)
    b += rows * embed * 4                # y scratch (f32, persists across vocab tiles)
    b += embed * 3 * f_seg * 2           # W_qkv (bf16, single-buffered)
    b += f * embed * 2 + embed * 4       # W_proj + b_proj (single-buffered)
    b += 2 * (embed * tv * 2 + tv * 4)   # W_out / b_out vocab tile (double-buffered)
    b += 2 * rows * tv * out_bytes       # logits out block (double-buffered)
    return b


def _choose_tiles(batch, seq, embed, f, f_seg, vocab, out_bytes,
                  budget=_VMEM_TILE_BUDGET):
    """Budget-driven (block_batch, vocab_tile, padded_vocab) selection."""
    # Block-batch: largest divisor of `batch`, capped at batch//2 so the batch grid
    # axis keeps >= 2 "parallel" steps (both v7x TensorCores get work; on v5e/v6e
    # it keeps the BlockSpec pipeline overlapping DMA with compute).
    bb = 1
    bb_cap = max(1, batch // 2)
    for d in range(1, bb_cap + 1):
        if batch % d == 0 and _step_vmem_bytes(d, seq, embed, f, f_seg, LANE,
                                               out_bytes) <= budget:
            bb = d
    # Vocab tile: largest multiple of 128 lanes (MXU/lane-dense stores on all of
    # v5e/v6e/v7x) that fits the budget, capped at the 128-padded vocab size.
    tv_cap = _round_up(vocab, LANE)
    tv = LANE
    while (tv + LANE <= tv_cap and
           _step_vmem_bytes(bb, seq, embed, f, f_seg, tv + LANE,
                            out_bytes) <= budget):
        tv += LANE
    vpad = _round_up(vocab, tv)
    return bb, tv, vpad


def _mha_lm_kernel(x_ref, wqkv_ref, wproj_ref, bproj_ref, wout_ref, bout_ref,
                   out_ref, y_ref, *, n_heads, head_size, f_seg):
    bb, t, e = x_ref.shape
    f = n_heads * head_size
    rows = bb * t
    tv = out_ref.shape[-1]

    # Attention + output projection run once per batch block (vocab tile 0); the
    # result is stashed in the y scratch and reused by every vocab tile.
    @pl.when(pl.program_id(1) == 0)
    def _attend():
        # Fused Q/K/V projection: one (rows, E) x (E, 3*f_seg) MXU matmul,
        # bf16 inputs / f32 accumulation.  Each segment starts on a 128-lane
        # boundary so the q/k/v extractions below never slice mid-vreg.
        x2 = x_ref[...].reshape(rows, e)
        qkv = jnp.dot(x2, wqkv_ref[...], preferred_element_type=jnp.float32)

        scale = 1.0 / (float(head_size) ** 0.5)
        q2 = qkv[:, 0:f] * scale                      # scale q (rows*F), not scores
        k2 = qkv[:, f_seg:f_seg + f]
        v2 = qkv[:, 2 * f_seg:2 * f_seg + f]

        # Single (T, T) causal mask, broadcast across batch (and heads).
        row_id = lax.broadcasted_iota(jnp.int32, (t, t), 0)
        col_id = lax.broadcasted_iota(jnp.int32, (t, t), 1)
        causal = (col_id <= row_id)[None, :, :]

        # Per-head attention.  Each head's output is folded straight into the
        # multi-head output projection (y += o_h @ Wproj_h): no concat, no live
        # per-head f32 buffers.  (See module TODO about heads-batched einsums.)
        y = bproj_ref[...]                            # (1, E) f32, broadcast in adds
        for h in range(n_heads):
            sl = slice(h * head_size, (h + 1) * head_size)
            qh = q2[:, sl].astype(jnp.bfloat16).reshape(bb, t, head_size)
            kh = k2[:, sl].astype(jnp.bfloat16).reshape(bb, t, head_size)
            vh = v2[:, sl].astype(jnp.bfloat16).reshape(bb, t, head_size)
            # Contract last dims directly — no explicit k.T / XLU transpose.
            s = jnp.einsum("bqd,bkd->bqk", qh, kh,
                           preferred_element_type=jnp.float32)       # (bb, t, t)
            s = jnp.where(causal, s, -1e30)     # finite: no inf-inf NaN on padded rows
            s = s - jnp.max(s, axis=-1, keepdims=True)
            p = jnp.exp(s)
            p = p * pl.reciprocal(jnp.sum(p, axis=-1, keepdims=True), approx=True)
            oh = jnp.einsum("bqk,bkd->bqd", p.astype(jnp.bfloat16), vh,
                            preferred_element_type=jnp.float32)      # (bb, t, hd)
            y = y + jnp.dot(oh.reshape(rows, head_size).astype(jnp.bfloat16),
                            wproj_ref[h], preferred_element_type=jnp.float32)
        y_ref[...] = y                                                # (rows, E) f32

    # Vocab tile: (rows, E) x (E, TV) matmul streamed per grid step (lane-dense,
    # 128-multiple N on every TPU generation).
    logits = jnp.dot(y_ref[...].astype(jnp.bfloat16), wout_ref[...],
                     preferred_element_type=jnp.float32) + bout_ref[...]
    out_ref[...] = logits.reshape(bb, t, tv).astype(out_ref.dtype)


def multihead_attention_lm_forward(tokens, params, *, head_size, n_heads,
                                   logits_dtype=jnp.float32,
                                   single_buffer_weights=True):
    """tokens: (B, T) int32.  Returns logits (B, T, vocab_size) in `logits_dtype`.

    Set logits_dtype=jnp.bfloat16 to halve output HBM traffic at realistic V.
    """
    tok_emb = params["tok_emb"]                              # (V, E)
    pos_emb = params["pos_emb"]                              # (context, E)
    wq, wk, wv = params["wq"], params["wk"], params["wv"]    # (nh, E, hd) each
    w_proj, b_proj = params["w_proj"], params["b_proj"]      # (F, E), (E,)
    w_out, b_out = params["w_out"], params["b_out"]          # (E, V), (V,)

    B, T = tokens.shape
    E = tok_emb.shape[1]
    V = w_out.shape[1]
    F = n_heads * head_size
    f_seg = _round_up(F, LANE)       # each of the Q/K/V segments is 128-lane aligned
    out_bytes = jnp.dtype(logits_dtype).itemsize

    bb, tv, vpad = _choose_tiles(B, T, E, F, f_seg, V, out_bytes)
    grid = (B // bb, vpad // tv)     # (batch blocks, vocab tiles) — vocab innermost

    # Glue: embedding gathers + position add (data-dependent gather stays in XLA).
    # bf16 halves the x DMA bytes and feeds the MXU natively.
    x = (tok_emb[tokens] + pos_emb[:T][None, :, :]).astype(jnp.bfloat16)

    # Fused QKV weight, (E, 3*f_seg): [Q heads | pad | K heads | pad | V heads | pad].
    wq_all = jnp.transpose(wq, (1, 0, 2)).reshape(E, F).astype(jnp.bfloat16)
    wk_all = jnp.transpose(wk, (1, 0, 2)).reshape(E, F).astype(jnp.bfloat16)
    wv_all = jnp.transpose(wv, (1, 0, 2)).reshape(E, F).astype(jnp.bfloat16)
    w_qkv = jnp.zeros((E, 3 * f_seg), jnp.bfloat16)
    w_qkv = w_qkv.at[:, 0:F].set(wq_all)
    w_qkv = w_qkv.at[:, f_seg:f_seg + F].set(wk_all)
    w_qkv = w_qkv.at[:, 2 * f_seg:2 * f_seg + F].set(wv_all)

    # Output projection stacked per head so the kernel indexes wproj_ref[h]
    # (leading-axis index) instead of lane-slicing a concatenated head tensor.
    w_proj_h = w_proj.reshape(n_heads, head_size, E).astype(jnp.bfloat16)
    b_proj_2d = b_proj.reshape(1, E).astype(jnp.float32)

    # Vocab weights padded to a multiple of the vocab tile (lane-dense stores,
    # clean MXU N); padded columns are zero and sliced off below.
    w_out_p = jnp.zeros((E, vpad), jnp.bfloat16).at[:, :V].set(
        w_out.astype(jnp.bfloat16))
    b_out_p = jnp.zeros((1, vpad), jnp.float32).at[:, :V].set(
        b_out.reshape(1, V).astype(jnp.float32))

    def _wspec(shape, index_map):
        # Constant-index weight/bias blocks are never re-fetched; single-buffer
        # them to halve their VMEM footprint (critical under v7x's 64 MiB).
        if single_buffer_weights:
            return pl.BlockSpec(shape, index_map, pipeline_mode=pl.Buffered(1))
        return pl.BlockSpec(shape, index_map)

    kernel = functools.partial(_mha_lm_kernel, n_heads=n_heads,
                               head_size=head_size, f_seg=f_seg)

    out_pad = pl.pallas_call(
        kernel,
        out_shape=jax.ShapeDtypeStruct((B, T, vpad), logits_dtype),
        grid_spec=pltpu.PrefetchScalarGridSpec(
            num_scalar_prefetch=0,
            grid=grid,
            in_specs=[
                pl.BlockSpec((bb, T, E), lambda b, v: (b, 0, 0)),          # x
                _wspec((E, 3 * f_seg), lambda b, v: (0, 0)),               # W_qkv
                _wspec((n_heads, head_size, E), lambda b, v: (0, 0, 0)),   # W_proj
                _wspec((1, E), lambda b, v: (0, 0)),                       # b_proj
                pl.BlockSpec((E, tv), lambda b, v: (0, v)),                # W_out tile
                pl.BlockSpec((1, tv), lambda b, v: (0, v)),                # b_out tile
            ],
            out_specs=pl.BlockSpec((bb, T, tv), lambda b, v: (b, 0, v)),
            scratch_shapes=[pltpu.VMEM((bb * T, E), jnp.float32)],         # y
        ),
        compiler_params=pltpu.CompilerParams(
            # Batch axis parallel (megacore); vocab axis must stay sequential
            # because vt > 0 reuses the y scratch written at vt == 0.
            dimension_semantics=("parallel", "arbitrary"),
            vmem_limit_bytes=_VMEM_LIMIT_BYTES),
    )(x, w_qkv, w_proj_h, b_proj_2d, w_out_p, b_out_p)

    return out_pad[:, :, :V]


def _reference_forward(tokens, params, *, head_size, n_heads):
    """Pure-JAX reference mirroring the PyTorch forward (matmul inputs in bf16
    with f32 accumulation, matching the kernel's precision choices)."""
    bf16, f32 = jnp.bfloat16, jnp.float32
    tok_emb, pos_emb = params["tok_emb"], params["pos_emb"]
    wq, wk, wv = params["wq"], params["wk"], params["wv"]
    w_proj, b_proj = params["w_proj"], params["b_proj"]
    w_out, b_out = params["w_out"], params["b_out"]
    B, T = tokens.shape
    x = (tok_emb[tokens] + pos_emb[:T][None, :, :]).astype(bf16)
    scale = float(head_size) ** -0.5
    mask = jnp.tril(jnp.ones((T, T), dtype=bool))
    heads = []
    for h in range(n_heads):
        q = jnp.einsum("bte,ed->btd", x, wq[h].astype(bf16),
                       preferred_element_type=f32) * scale
        k = jnp.einsum("bte,ed->btd", x, wk[h].astype(bf16),
                       preferred_element_type=f32)
        v = jnp.einsum("bte,ed->btd", x, wv[h].astype(bf16),
                       preferred_element_type=f32)
        s = jnp.einsum("bqd,bkd->bqk", q.astype(bf16), k.astype(bf16),
                       preferred_element_type=f32)
        s = jnp.where(mask[None], s, -jnp.inf)
        p = jax.nn.softmax(s, axis=-1)
        heads.append(jnp.einsum("bqk,bkd->bqd", p.astype(bf16), v.astype(bf16),
                                preferred_element_type=f32))
    att = jnp.concatenate(heads, axis=-1)
    y = jnp.einsum("btf,fe->bte", att.astype(bf16), w_proj.astype(bf16),
                   preferred_element_type=f32) + b_proj
    return jnp.einsum("bte,ev->btv", y.astype(bf16), w_out.astype(bf16),
                      preferred_element_type=f32) + b_out


def make_params(key, *, context_size, vocab_size, embed_size, head_size, n_heads):
    ks = jax.random.split(key, 9)
    f32 = jnp.float32
    F = n_heads * head_size
    return {
        # nn.Embedding default init: N(0, 1)
        "tok_emb": jax.random.normal(ks[0], (vocab_size, embed_size), f32),
        "pos_emb": jax.random.normal(ks[1], (context_size, embed_size), f32),
        # per-head bias-free q/k/v projections (nn.Linear(embed, head, bias=False))
        "wq": jax.random.normal(ks[2], (n_heads, embed_size, head_size), f32) * 0.1,
        "wk": jax.random.normal(ks[3], (n_heads, embed_size, head_size), f32) * 0.1,
        "wv": jax.random.normal(ks[4], (n_heads, embed_size, head_size), f32) * 0.1,
        # multi-head output projection nn.Linear(n_heads*head_size, embed_size)
        "w_proj": jax.random.normal(ks[5], (F, embed_size), f32) * 0.1,
        "b_proj": jax.random.normal(ks[6], (embed_size,), f32) * 0.1,
        # output layer nn.Linear(embed_size, vocab_size)
        "w_out": jax.random.normal(ks[7], (embed_size, vocab_size), f32) * 0.1,
        "b_out": jax.random.normal(ks[8], (vocab_size,), f32) * 0.1,
    }


if __name__ == "__main__":
    context_size = 8
    vocab_size = 65
    embed_size = 32
    head_size = 16
    n_heads = 4
    batch = 2

    key = jax.random.PRNGKey(0)
    pkey, tkey = jax.random.split(key)
    params = make_params(pkey, context_size=context_size, vocab_size=vocab_size,
                         embed_size=embed_size, head_size=head_size,
                         n_heads=n_heads)
    tokens = jax.random.randint(tkey, (batch, context_size), 0, vocab_size,
                                dtype=jnp.int32)

    def _run(single_buffer_weights):
        return jax.block_until_ready(
            multihead_attention_lm_forward(
                tokens, params, head_size=head_size, n_heads=n_heads,
                logits_dtype=jnp.float32,
                single_buffer_weights=single_buffer_weights))

    try:
        logits = _run(True)
    except Exception:
        # pl.Buffered(1) single-buffering support varies across JAX releases; the
        # fallback only restores default double-buffering of the weight blocks.
        logits = _run(False)

    ref = _reference_forward(tokens, params, head_size=head_size, n_heads=n_heads)
    assert logits.shape == (batch, context_size, vocab_size)
    max_err = float(jnp.max(jnp.abs(logits - ref)))
    assert jnp.allclose(logits, ref, atol=2e-2, rtol=2e-2), (
        "mismatch vs reference, max|diff|=%g" % max_err)

    print("KERNEL_OK")
</pallas_src>

<mosaic_0001>
module attributes {stable_mosaic.version = 11 : i64} {
  func.func @_mha_lm_kernel(%arg0: i32, %arg1: i32, %arg2: memref<1x8x32xbf16, #tpu.memory_space<vmem>>, %arg3: memref<32x384xbf16, #tpu.memory_space<vmem>>, %arg4: memref<4x16x32xbf16, #tpu.memory_space<vmem>>, %arg5: memref<1x32xf32, #tpu.memory_space<vmem>>, %arg6: memref<32x128xbf16, #tpu.memory_space<vmem>>, %arg7: memref<1x128xf32, #tpu.memory_space<vmem>>, %arg8: memref<1x8x128xf32, #tpu.memory_space<vmem>>, %arg9: memref<8x32xf32, #tpu.memory_space<vmem>>) attributes {dimension_semantics = [#tpu.dimension_semantics<parallel>, #tpu.dimension_semantics<arbitrary>], iteration_bounds = array<i64: 2, 1>, scalar_prefetch = 0 : i64, scratch_operands = 1 : i64, tpu.core_type = #tpu.core_type<tc>, window_params = [{transform_indices = @transform_0, window_bounds = array<i64: 1, 8, 32>}, {pipeline_mode = #tpu.pipeline_mode<synchronous>, transform_indices = @transform_1, window_bounds = array<i64: 32, 384>}, {pipeline_mode = #tpu.pipeline_mode<synchronous>, transform_indices = @transform_2, window_bounds = array<i64: 4, 16, 32>}, {pipeline_mode = #tpu.pipeline_mode<synchronous>, transform_indices = @transform_3, window_bounds = array<i64: 1, 32>}, {transform_indices = @transform_4, window_bounds = array<i64: 32, 128>}, {transform_indices = @transform_5, window_bounds = array<i64: 1, 128>}, {transform_indices = @transform_6, window_bounds = array<i64: 1, 8, 128>}]} {
    %c0_i32 = arith.constant 0 : i32
    %0 = arith.cmpi eq, %arg1, %c0_i32 : i32
    %1 = arith.extui %0 : i1 to i32
    %c0_i32_0 = arith.constant 0 : i32
    %2 = arith.cmpi ne, %1, %c0_i32_0 : i32
    scf.if %2 {
      %c0_9 = arith.constant 0 : index
      %c0_10 = arith.constant 0 : index
      %c0_11 = arith.constant 0 : index
      %12 = vector.load %arg2[%c0_9, %c0_10, %c0_11] : memref<1x8x32xbf16, #tpu.memory_space<vmem>>, vector<1x8x32xbf16>
      %13 = vector.shape_cast %12 : vector<1x8x32xbf16> to vector<8x32xbf16>
      %c0_12 = arith.constant 0 : index
      %c0_13 = arith.constant 0 : index
      %14 = vector.load %arg3[%c0_12, %c0_13] : memref<32x384xbf16, #tpu.memory_space<vmem>>, vector<32x384xbf16>
      %cst_14 = arith.constant dense<0.000000e+00> : vector<8x384xf32>
      %15 = tpu.matmul %13, %14, %cst_14 {dimension_numbers = #tpu.dot_dimension_numbers<[1], [0], [0], [1], [0, 0, 1, 1], [], []>} : vector<8x32xbf16>, vector<32x384xbf16>, vector<8x384xf32> -> vector<8x384xf32>
      %16 = vector.extract_strided_slice %15 {offsets = [0, 0], sizes = [8, 64], strides = [1, 1]} : vector<8x384xf32> to vector<8x64xf32>
      %cst_15 = arith.constant 2.500000e-01 : f32
      %17 = vector.broadcast %cst_15 : f32 to vector<8x64xf32>
      %18 = arith.mulf %16, %17 : vector<8x64xf32>
      %19 = vector.extract_strided_slice %15 {offsets = [0, 128], sizes = [8, 64], strides = [1, 1]} : vector<8x384xf32> to vector<8x64xf32>
      %20 = vector.extract_strided_slice %15 {offsets = [0, 256], sizes = [8, 64], strides = [1, 1]} : vector<8x384xf32> to vector<8x64xf32>
      %21 = tpu.iota {dimensions = array<i32: 0>} : vector<8x8xi32>
      %22 = tpu.iota {dimensions = array<i32: 1>} : vector<8x8xi32>
      %23 = arith.cmpi sle, %22, %21 : vector<8x8xi32>
      %24 = vector.shape_cast %23 : vector<8x8xi1> to vector<1x8x8xi1>
      %c0_16 = arith.constant 0 : index
      %c0_17 = arith.constant 0 : index
      %25 = vector.load %arg5[%c0_16, %c0_17] : memref<1x32xf32, #tpu.memory_space<vmem>>, vector<1x32xf32>
      %26 = vector.extract_strided_slice %18 {offsets = [0, 0], sizes = [8, 16], strides = [1, 1]} : vector<8x64xf32> to vector<8x16xf32>
      %27 = arith.truncf %26 : vector<8x16xf32> to vector<8x16xbf16>
      %28 = vector.shape_cast %27 : vector<8x16xbf16> to vector<1x8x16xbf16>
      %29 = vector.extract_strided_slice %19 {offsets = [0, 0], sizes = [8, 16], strides = [1, 1]} : vector<8x64xf32> to vector<8x16xf32>
      %30 = arith.truncf %29 : vector<8x16xf32> to vector<8x16xbf16>
      %31 = vector.shape_cast %30 : vector<8x16xbf16> to vector<1x8x16xbf16>
      %32 = vector.extract_strided_slice %20 {offsets = [0, 0], sizes = [8, 16], strides = [1, 1]} : vector<8x64xf32> to vector<8x16xf32>
      %33 = arith.truncf %32 : vector<8x16xf32> to vector<8x16xbf16>
      %34 = vector.shape_cast %33 : vector<8x16xbf16> to vector<1x8x16xbf16>
      "tpu.trace_start"() <{level = 10 : i32, message = "bqd,bkd->bqk"}> : () -> ()
      %cst_18 = arith.constant dense<0.000000e+00> : vector<1x8x8xf32>
      %35 = tpu.matmul %28, %31, %cst_18 {dimension_numbers = #tpu.dot_dimension_numbers<[2], [2], [1], [1], [0, 0, 0, 1, 1, 1], [0], [0]>} : vector<1x8x16xbf16>, vector<1x8x16xbf16>, vector<1x8x8xf32> -> vector<1x8x8xf32>
      %cst_19 = arith.constant -1.000000e+30 : f32
      "tpu.trace_stop"() : () -> ()
      %36 = vector.broadcast %cst_19 : f32 to vector<1x8x8xf32>
      %37 = arith.select %24, %35, %36 : vector<1x8x8xi1>, vector<1x8x8xf32>
      %cst_20 = arith.constant dense<0xFF800000> : vector<1x8xf32>
      %38 = vector.multi_reduction <maximumf>, %37, %cst_20 [2] : vector<1x8x8xf32> to vector<1x8xf32>
      %39 = vector.shape_cast %38 : vector<1x8xf32> to vector<1x8x1xf32>
      %40 = vector.broadcast %39 : vector<1x8x1xf32> to vector<1x8x8xf32>
      %41 = arith.subf %37, %40 : vector<1x8x8xf32>
      %42 = math.exp %41 : vector<1x8x8xf32>
      %cst_21 = arith.constant dense<0.000000e+00> : vector<1x8xf32>
      %43 = vector.multi_reduction <add>, %42, %cst_21 [2] : vector<1x8x8xf32> to vector<1x8xf32>
      %44 = vector.shape_cast %43 : vector<1x8xf32> to vector<1x8x1xf32>
      %45 = tpu.reciprocal %44 {approx = true} : vector<1x8x1xf32> -> vector<1x8x1xf32>
      %46 = vector.broadcast %45 : vector<1x8x1xf32> to vector<1x8x8xf32>
      %47 = arith.mulf %42, %46 : vector<1x8x8xf32>
      %48 = arith.truncf %47 : vector<1x8x8xf32> to vector<1x8x8xbf16>
      "tpu.trace_start"() <{level = 10 : i32, message = "bqk,bkd->bqd"}> : () -> ()
      %cst_22 = arith.constant dense<0.000000e+00> : vector<1x8x16xf32>
      %49 = tpu.matmul %48, %34, %cst_22 {dimension_numbers = #tpu.dot_dimension_numbers<[2], [1], [1], [2], [0, 0, 0, 1, 1, 2], [0], [0]>} : vector<1x8x8xbf16>, vector<1x8x16xbf16>, vector<1x8x16xf32> -> vector<1x8x16xf32>
      "tpu.trace_stop"() : () -> ()
      %50 = vector.shape_cast %49 : vector<1x8x16xf32> to vector<8x16xf32>
      %51 = arith.truncf %50 : vector<8x16xf32> to vector<8x16xbf16>
      %c0_23 = arith.constant 0 : index
      %c0_24 = arith.constant 0 : index
      %c0_25 = arith.constant 0 : index
      %52 = vector.load %arg4[%c0_23, %c0_24, %c0_25] : memref<4x16x32xbf16, #tpu.memory_space<vmem>>, vector<1x16x32xbf16>
      %53 = vector.shape_cast %52 : vector<1x16x32xbf16> to vector<16x32xbf16>
      %cst_26 = arith.constant dense<0.000000e+00> : vector<8x32xf32>
      %54 = tpu.matmul %51, %53, %cst_26 {dimension_numbers = #tpu.dot_dimension_numbers<[1], [0], [0], [1], [0, 0, 1, 1], [], []>} : vector<8x16xbf16>, vector<16x32xbf16>, vector<8x32xf32> -> vector<8x32xf32>
      %55 = vector.broadcast %25 : vector<1x32xf32> to vector<8x32xf32>
      %56 = arith.addf %55, %54 : vector<8x32xf32>
      %57 = vector.extract_strided_slice %18 {offsets = [0, 16], sizes = [8, 16], strides = [1, 1]} : vector<8x64xf32> to vector<8x16xf32>
      %58 = arith.truncf %57 : vector<8x16xf32> to vector<8x16xbf16>
      %59 = vector.shape_cast %58 : vector<8x16xbf16> to vector<1x8x16xbf16>
      %60 = vector.extract_strided_slice %19 {offsets = [0, 16], sizes = [8, 16], strides = [1, 1]} : vector<8x64xf32> to vector<8x16xf32>
      %61 = arith.truncf %60 : vector<8x16xf32> to vector<8x16xbf16>
      %62 = vector.shape_cast %61 : vector<8x16xbf16> to vector<1x8x16xbf16>
      %63 = vector.extract_strided_slice %20 {offsets = [0, 16], sizes = [8, 16], strides = [1, 1]} : vector<8x64xf32> to vector<8x16xf32>
      %64 = arith.truncf %63 : vector<8x16xf32> to vector<8x16xbf16>
      %65 = vector.shape_cast %64 : vector<8x16xbf16> to vector<1x8x16xbf16>
      "tpu.trace_start"() <{level = 10 : i32, message = "bqd,bkd->bqk"}> : () -> ()
      %cst_27 = arith.constant dense<0.000000e+00> : vector<1x8x8xf32>
      %66 = tpu.matmul %59, %62, %cst_27 {dimension_numbers = #tpu.dot_dimension_numbers<[2], [2], [1], [1], [0, 0, 0, 1, 1, 1], [0], [0]>} : vector<1x8x16xbf16>, vector<1x8x16xbf16>, vector<1x8x8xf32> -> vector<1x8x8xf32>
      %cst_28 = arith.constant -1.000000e+30 : f32
      "tpu.trace_stop"() : () -> ()
      %67 = vector.broadcast %cst_28 : f32 to vector<1x8x8xf32>
      %68 = arith.select %24, %66, %67 : vector<1x8x8xi1>, vector<1x8x8xf32>
      %cst_29 = arith.constant dense<0xFF800000> : vector<1x8xf32>
      %69 = vector.multi_reduction <maximumf>, %68, %cst_29 [2] : vector<1x8x8xf32> to vector<1x8xf32>
      %70 = vector.shape_cast %69 : vector<1x8xf32> to vector<1x8x1xf32>
      %71 = vector.broadcast %70 : vector<1x8x1xf32> to vector<1x8x8xf32>
      %72 = arith.subf %68, %71 : vector<1x8x8xf32>
      %73 = math.exp %72 : vector<1x8x8xf32>
      %cst_30 = arith.constant dense<0.000000e+00> : vector<1x8xf32>
      %74 = vector.multi_reduction <add>, %73, %cst_30 [2] : vector<1x8x8xf32> to vector<1x8xf32>
      %75 = vector.shape_cast %74 : vector<1x8xf32> to vector<1x8x1xf32>
      %76 = tpu.reciprocal %75 {approx = true} : vector<1x8x1xf32> -> vector<1x8x1xf32>
      %77 = vector.broadcast %76 : vector<1x8x1xf32> to vector<1x8x8xf32>
      %78 = arith.mulf %73, %77 : vector<1x8x8xf32>
      %79 = arith.truncf %78 : vector<1x8x8xf32> to vector<1x8x8xbf16>
      "tpu.trace_start"() <{level = 10 : i32, message = "bqk,bkd->bqd"}> : () -> ()
      %cst_31 = arith.constant dense<0.000000e+00> : vector<1x8x16xf32>
      %80 = tpu.matmul %79, %65, %cst_31 {dimension_numbers = #tpu.dot_dimension_numbers<[2], [1], [1], [2], [0, 0, 0, 1, 1, 2], [0], [0]>} : vector<1x8x8xbf16>, vector<1x8x16xbf16>, vector<1x8x16xf32> -> vector<1x8x16xf32>
      "tpu.trace_stop"() : () -> ()
      %81 = vector.shape_cast %80 : vector<1x8x16xf32> to vector<8x16xf32>
      %82 = arith.truncf %81 : vector<8x16xf32> to vector<8x16xbf16>
      %c1 = arith.constant 1 : index
      %c0_32 = arith.constant 0 : index
      %c0_33 = arith.constant 0 : index
      %83 = vector.load %arg4[%c1, %c0_32, %c0_33] : memref<4x16x32xbf16, #tpu.memory_space<vmem>>, vector<1x16x32xbf16>
      %84 = vector.shape_cast %83 : vector<1x16x32xbf16> to vector<16x32xbf16>
      %cst_34 = arith.constant dense<0.000000e+00> : vector<8x32xf32>
      %85 = tpu.matmul %82, %84, %cst_34 {dimension_numbers = #tpu.dot_dimension_numbers<[1], [0], [0], [1], [0, 0, 1, 1], [], []>} : vector<8x16xbf16>, vector<16x32xbf16>, vector<8x32xf32> -> vector<8x32xf32>
      %86 = arith.addf %56, %85 : vector<8x32xf32>
      %87 = vector.extract_strided_slice %18 {offsets = [0, 32], sizes = [8, 16], strides = [1, 1]} : vector<8x64xf32> to vector<8x16xf32>
      %88 = arith.truncf %87 : vector<8x16xf32> to vector<8x16xbf16>
      %89 = vector.shape_cast %88 : vector<8x16xbf16> to vector<1x8x16xbf16>
      %90 = vector.extract_strided_slice %19 {offsets = [0, 32], sizes = [8, 16], strides = [1, 1]} : vector<8x64xf32> to vector<8x16xf32>
      %91 = arith.truncf %90 : vector<8x16xf32> to vector<8x16xbf16>
      %92 = vector.shape_cast %91 : vector<8x16xbf16> to vector<1x8x16xbf16>
      %93 = vector.extract_strided_slice %20 {offsets = [0, 32], sizes = [8, 16], strides = [1, 1]} : vector<8x64xf32> to vector<8x16xf32>
      %94 = arith.truncf %93 : vector<8x16xf32> to vector<8x16xbf16>
      %95 = vector.shape_cast %94 : vector<8x16xbf16> to vector<1x8x16xbf16>
      "tpu.trace_start"() <{level = 10 : i32, message = "bqd,bkd->bqk"}> : () -> ()
      %cst_35 = arith.constant dense<0.000000e+00> : vector<1x8x8xf32>
      %96 = tpu.matmul %89, %92, %cst_35 {dimension_numbers = #tpu.dot_dimension_numbers<[2], [2], [1], [1], [0, 0, 0, 1, 1, 1], [0], [0]>} : vector<1x8x16xbf16>, vector<1x8x16xbf16>, vector<1x8x8xf32> -> vector<1x8x8xf32>
      %cst_36 = arith.constant -1.000000e+30 : f32
      "tpu.trace_stop"() : () -> ()
      %97 = vector.broadcast %cst_36 : f32 to vector<1x8x8xf32>
      %98 = arith.select %24, %96, %97 : vector<1x8x8xi1>, vector<1x8x8xf32>
      %cst_37 = arith.constant dense<0xFF800000> : vector<1x8xf32>
      %99 = vector.multi_reduction <maximumf>, %98, %cst_37 [2] : vector<1x8x8xf32> to vector<1x8xf32>
      %100 = vector.shape_cast %99 : vector<1x8xf32> to vector<1x8x1xf32>
      %101 = vector.broadcast %100 : vector<1x8x1xf32> to vector<1x8x8xf32>
      %102 = arith.subf %98, %101 : vector<1x8x8xf32>
      %103 = math.exp %102 : vector<1x8x8xf32>
      %cst_38 = arith.constant dense<0.000000e+00> : vector<1x8xf32>
      %104 = vector.multi_reduction <add>, %103, %cst_38 [2] : vector<1x8x8xf32> to vector<1x8xf32>
      %105 = vector.shape_cast %104 : vector<1x8xf32> to vector<1x8x1xf32>
      %106 = tpu.reciprocal %105 {approx = true} : vector<1x8x1xf32> -> vector<1x8x1xf32>
      %107 = vector.broadcast %106 : vector<1x8x1xf32> to vector<1x8x8xf32>
      %108 = arith.mulf %103, %107 : vector<1x8x8xf32>
      %109 = arith.truncf %108 : vector<1x8x8xf32> to vector<1x8x8xbf16>
      "tpu.trace_start"() <{level = 10 : i32, message = "bqk,bkd->bqd"}> : () -> ()
      %cst_39 = arith.constant dense<0.000000e+00> : vector<1x8x16xf32>
      %110 = tpu.matmul %109, %95, %cst_39 {dimension_numbers = #tpu.dot_dimension_numbers<[2], [1], [1], [2], [0, 0, 0, 1, 1, 2], [0], [0]>} : vector<1x8x8xbf16>, vector<1x8x16xbf16>, vector<1x8x16xf32> -> vector<1x8x16xf32>
      "tpu.trace_stop"() : () -> ()
      %111 = vector.shape_cast %110 : vector<1x8x16xf32> to vector<8x16xf32>
      %112 = arith.truncf %111 : vector<8x16xf32> to vector<8x16xbf16>
      %c2 = arith.constant 2 : index
      %c0_40 = arith.constant 0 : index
      %c0_41 = arith.constant 0 : index
      %113 = vector.load %arg4[%c2, %c0_40, %c0_41] : memref<4x16x32xbf16, #tpu.memory_space<vmem>>, vector<1x16x32xbf16>
      %114 = vector.shape_cast %113 : vector<1x16x32xbf16> to vector<16x32xbf16>
      %cst_42 = arith.constant dense<0.000000e+00> : vector<8x32xf32>
      %115 = tpu.matmul %112, %114, %cst_42 {dimension_numbers = #tpu.dot_dimension_numbers<[1], [0], [0], [1], [0, 0, 1, 1], [], []>} : vector<8x16xbf16>, vector<16x32xbf16>, vector<8x32xf32> -> vector<8x32xf32>
      %116 = arith.addf %86, %115 : vector<8x32xf32>
      %117 = vector.extract_strided_slice %18 {offsets = [0, 48], sizes = [8, 16], strides = [1, 1]} : vector<8x64xf32> to vector<8x16xf32>
      %118 = arith.truncf %117 : vector<8x16xf32> to vector<8x16xbf16>
      %119 = vector.shape_cast %118 : vector<8x16xbf16> to vector<1x8x16xbf16>
      %120 = vector.extract_strided_slice %19 {offsets = [0, 48], sizes = [8, 16], strides = [1, 1]} : vector<8x64xf32> to vector<8x16xf32>
      %121 = arith.truncf %120 : vector<8x16xf32> to vector<8x16xbf16>
      %122 = vector.shape_cast %121 : vector<8x16xbf16> to vector<1x8x16xbf16>
      %123 = vector.extract_strided_slice %20 {offsets = [0, 48], sizes = [8, 16], strides = [1, 1]} : vector<8x64xf32> to vector<8x16xf32>
      %124 = arith.truncf %123 : vector<8x16xf32> to vector<8x16xbf16>
      %125 = vector.shape_cast %124 : vector<8x16xbf16> to vector<1x8x16xbf16>
      "tpu.trace_start"() <{level = 10 : i32, message = "bqd,bkd->bqk"}> : () -> ()
      %cst_43 = arith.constant dense<0.000000e+00> : vector<1x8x8xf32>
      %126 = tpu.matmul %119, %122, %cst_43 {dimension_numbers = #tpu.dot_dimension_numbers<[2], [2], [1], [1], [0, 0, 0, 1, 1, 1], [0], [0]>} : vector<1x8x16xbf16>, vector<1x8x16xbf16>, vector<1x8x8xf32> -> vector<1x8x8xf32>
      %cst_44 = arith.constant -1.000000e+30 : f32
      "tpu.trace_stop"() : () -> ()
      %127 = vector.broadcast %cst_44 : f32 to vector<1x8x8xf32>
      %128 = arith.select %24, %126, %127 : vector<1x8x8xi1>, vector<1x8x8xf32>
      %cst_45 = arith.constant dense<0xFF800000> : vector<1x8xf32>
      %129 = vector.multi_reduction <maximumf>, %128, %cst_45 [2] : vector<1x8x8xf32> to vector<1x8xf32>
      %130 = vector.shape_cast %129 : vector<1x8xf32> to vector<1x8x1xf32>
      %131 = vector.broadcast %130 : vector<1x8x1xf32> to vector<1x8x8xf32>
      %132 = arith.subf %128, %131 : vector<1x8x8xf32>
      %133 = math.exp %132 : vector<1x8x8xf32>
      %cst_46 = arith.constant dense<0.000000e+00> : vector<1x8xf32>
      %134 = vector.multi_reduction <add>, %133, %cst_46 [2] : vector<1x8x8xf32> to vector<1x8xf32>
      %135 = vector.shape_cast %134 : vector<1x8xf32> to vector<1x8x1xf32>
      %136 = tpu.reciprocal %135 {approx = true} : vector<1x8x1xf32> -> vector<1x8x1xf32>
      %137 = vector.broadcast %136 : vector<1x8x1xf32> to vector<1x8x8xf32>
      %138 = arith.mulf %133, %137 : vector<1x8x8xf32>
      %139 = arith.truncf %138 : vector<1x8x8xf32> to vector<1x8x8xbf16>
      "tpu.trace_start"() <{level = 10 : i32, message = "bqk,bkd->bqd"}> : () -> ()
      %cst_47 = arith.constant dense<0.000000e+00> : vector<1x8x16xf32>
      %140 = tpu.matmul %139, %125, %cst_47 {dimension_numbers = #tpu.dot_dimension_numbers<[2], [1], [1], [2], [0, 0, 0, 1, 1, 2], [0], [0]>} : vector<1x8x8xbf16>, vector<1x8x16xbf16>, vector<1x8x16xf32> -> vector<1x8x16xf32>
      "tpu.trace_stop"() : () -> ()
      %141 = vector.shape_cast %140 : vector<1x8x16xf32> to vector<8x16xf32>
      %142 = arith.truncf %141 : vector<8x16xf32> to vector<8x16xbf16>
      %c3 = arith.constant 3 : index
      %c0_48 = arith.constant 0 : index
      %c0_49 = arith.constant 0 : index
      %143 = vector.load %arg4[%c3, %c0_48, %c0_49] : memref<4x16x32xbf16, #tpu.memory_space<vmem>>, vector<1x16x32xbf16>
      %144 = vector.shape_cast %143 : vector<1x16x32xbf16> to vector<16x32xbf16>
      %cst_50 = arith.constant dense<0.000000e+00> : vector<8x32xf32>
      %145 = tpu.matmul %142, %144, %cst_50 {dimension_numbers = #tpu.dot_dimension_numbers<[1], [0], [0], [1], [0, 0, 1, 1], [], []>} : vector<8x16xbf16>, vector<16x32xbf16>, vector<8x32xf32> -> vector<8x32xf32>
      %146 = arith.addf %116, %145 : vector<8x32xf32>
      %c0_51 = arith.constant 0 : index
      %c0_52 = arith.constant 0 : index
      %147 = vector.load %arg9[%c0_51, %c0_52] : memref<8x32xf32, #tpu.memory_space<vmem>>, vector<8x32xf32>
      tpu.vector_store %arg9[%c0_51, %c0_52], %146 {strides = array<i32>} : memref<8x32xf32, #tpu.memory_space<vmem>>, vector<8x32xf32>,
    } else {
    }
    %c0 = arith.constant 0 : index
    %c0_1 = arith.constant 0 : index
    %3 = vector.load %arg9[%c0, %c0_1] : memref<8x32xf32, #tpu.memory_space<vmem>>, vector<8x32xf32>
    %4 = arith.truncf %3 : vector<8x32xf32> to vector<8x32xbf16>
    %c0_2 = arith.constant 0 : index
    %c0_3 = arith.constant 0 : index
    %5 = vector.load %arg6[%c0_2, %c0_3] : memref<32x128xbf16, #tpu.memory_space<vmem>>, vector<32x128xbf16>
    %cst = arith.constant dense<0.000000e+00> : vector<8x128xf32>
    %6 = tpu.matmul %4, %5, %cst {dimension_numbers = #tpu.dot_dimension_numbers<[1], [0], [0], [1], [0, 0, 1, 1], [], []>} : vector<8x32xbf16>, vector<32x128xbf16>, vector<8x128xf32> -> vector<8x128xf32>
    %c0_4 = arith.constant 0 : index
    %c0_5 = arith.constant 0 : index
    %7 = vector.load %arg7[%c0_4, %c0_5] : memref<1x128xf32, #tpu.memory_space<vmem>>, vector<1x128xf32>
    %8 = vector.broadcast %7 : vector<1x128xf32> to vector<8x128xf32>
    %9 = arith.addf %6, %8 : vector<8x128xf32>
    %10 = vector.shape_cast %9 : vector<8x128xf32> to vector<1x8x128xf32>
    %c0_6 = arith.constant 0 : index
    %c0_7 = arith.constant 0 : index
    %c0_8 = arith.constant 0 : index
    %11 = vector.load %arg8[%c0_6, %c0_7, %c0_8] : memref<1x8x128xf32, #tpu.memory_space<vmem>>, vector<1x8x128xf32>
    tpu.vector_store %arg8[%c0_6, %c0_7, %c0_8], %10 {strides = array<i32>} : memref<1x8x128xf32, #tpu.memory_space<vmem>>, vector<1x8x128xf32>,
    return
  }
  func.func @transform_0(%arg0: i32, %arg1: i32) -> (i32, i32, i32) {
    %c0_i32 = arith.constant 0 : i32
    %c0_i32_0 = arith.constant 0 : i32
    %c0_i32_1 = arith.constant 0 : i32
    return %arg0, %c0_i32, %c0_i32_0 : i32, i32, i32
  }
  func.func @transform_1(%arg0: i32, %arg1: i32) -> (i32, i32) {
    %c0_i32 = arith.constant 0 : i32
    %c0_i32_0 = arith.constant 0 : i32
    %c0_i32_1 = arith.constant 0 : i32
    return %c0_i32, %c0_i32_0 : i32, i32
  }
  func.func @transform_2(%arg0: i32, %arg1: i32) -> (i32, i32, i32) {
    %c0_i32 = arith.constant 0 : i32
    %c0_i32_0 = arith.constant 0 : i32
    %c0_i32_1 = arith.constant 0 : i32
    %c0_i32_2 = arith.constant 0 : i32
    return %c0_i32, %c0_i32_0, %c0_i32_1 : i32, i32, i32
  }
  func.func @transform_3(%arg0: i32, %arg1: i32) -> (i32, i32) {
    %c0_i32 = arith.constant 0 : i32
    %c0_i32_0 = arith.constant 0 : i32
    %c0_i32_1 = arith.constant 0 : i32
    return %c0_i32, %c0_i32_0 : i32, i32
  }
  func.func @transform_4(%arg0: i32, %arg1: i32) -> (i32, i32) {
    %c0_i32 = arith.constant 0 : i32
    %c0_i32_0 = arith.constant 0 : i32
    return %c0_i32, %arg1 : i32, i32
  }
  func.func @transform_5(%arg0: i32, %arg1: i32) -> (i32, i32) {
    %c0_i32 = arith.constant 0 : i32
    %c0_i32_0 = arith.constant 0 : i32
    return %c0_i32, %arg1 : i32, i32
  }
  func.func @transform_6(%arg0: i32, %arg1: i32) -> (i32, i32, i32) {
    %c0_i32 = arith.constant 0 : i32
    %c0_i32_0 = arith.constant 0 : i32
    return %arg0, %c0_i32, %arg1 : i32, i32, i32
  }
}

module attributes {stable_mosaic.version = 11 : i64} {
  func.func @_mha_lm_kernel(%arg0: i32, %arg1: i32, %arg2: memref<1x8x32xbf16, #tpu.memory_space<vmem>>, %arg3: memref<32x384xbf16, #tpu.memory_space<vmem>>, %arg4: memref<4x16x32xbf16, #tpu.memory_space<vmem>>, %arg5: memref<1x32xf32, #tpu.memory_space<vmem>>, %arg6: memref<32x128xbf16, #tpu.memory_space<vmem>>, %arg7: memref<1x128xf32, #tpu.memory_space<vmem>>, %arg8: memref<1x8x128xf32, #tpu.memory_space<vmem>>, %arg9: memref<8x32xf32, #tpu.memory_space<vmem>>) attributes {dimension_semantics = [#tpu.dimension_semantics<parallel>, #tpu.dimension_semantics<arbitrary>], iteration_bounds = array<i64: 2, 1>, scalar_prefetch = 0 : i64, scratch_operands = 1 : i64, tpu.core_type = #tpu.core_type<tc>, window_params = [{transform_indices = @transform_0, window_bounds = array<i64: 1, 8, 32>}, {pipeline_mode = #tpu.pipeline_mode<synchronous>, transform_indices = @transform_1, window_bounds = array<i64: 32, 384>}, {pipeline_mode = #tpu.pipeline_mode<synchronous>, transform_indices = @transform_2, window_bounds = array<i64: 4, 16, 32>}, {pipeline_mode = #tpu.pipeline_mode<synchronous>, transform_indices = @transform_3, window_bounds = array<i64: 1, 32>}, {transform_indices = @transform_4, window_bounds = array<i64: 32, 128>}, {transform_indices = @transform_5, window_bounds = array<i64: 1, 128>}, {transform_indices = @transform_6, window_bounds = array<i64: 1, 8, 128>}]} {
    %c0_i32 = arith.constant 0 : i32
    %0 = arith.cmpi eq, %arg1, %c0_i32 : i32
    %1 = arith.extui %0 : i1 to i32
    %c0_i32_0 = arith.constant 0 : i32
    %2 = arith.cmpi ne, %1, %c0_i32_0 : i32
    scf.if %2 {
      %c0_9 = arith.constant 0 : index
      %c0_10 = arith.constant 0 : index
      %c0_11 = arith.constant 0 : index
      %12 = vector.load %arg2[%c0_9, %c0_10, %c0_11] : memref<1x8x32xbf16, #tpu.memory_space<vmem>>, vector<1x8x32xbf16>
      %13 = vector.shape_cast %12 : vector<1x8x32xbf16> to vector<8x32xbf16>
      %c0_12 = arith.constant 0 : index
      %c0_13 = arith.constant 0 : index
      %14 = vector.load %arg3[%c0_12, %c0_13] : memref<32x384xbf16, #tpu.memory_space<vmem>>, vector<32x384xbf16>
      %cst_14 = arith.constant dense<0.000000e+00> : vector<8x384xf32>
      %15 = tpu.matmul %13, %14, %cst_14 {dimension_numbers = #tpu.dot_dimension_numbers<[1], [0], [0], [1], [0, 0, 1, 1], [], []>} : vector<8x32xbf16>, vector<32x384xbf16>, vector<8x384xf32> -> vector<8x384xf32>
      %16 = vector.extract_strided_slice %15 {offsets = [0, 0], sizes = [8, 64], strides = [1, 1]} : vector<8x384xf32> to vector<8x64xf32>
      %cst_15 = arith.constant 2.500000e-01 : f32
      %17 = vector.broadcast %cst_15 : f32 to vector<8x64xf32>
      %18 = arith.mulf %16, %17 : vector<8x64xf32>
      %19 = vector.extract_strided_slice %15 {offsets = [0, 128], sizes = [8, 64], strides = [1, 1]} : vector<8x384xf32> to vector<8x64xf32>
      %20 = vector.extract_strided_slice %15 {offsets = [0, 256], sizes = [8, 64], strides = [1, 1]} : vector<8x384xf32> to vector<8x64xf32>
      %21 = tpu.iota {dimensions = array<i32: 0>} : vector<8x8xi32>
      %22 = tpu.iota {dimensions = array<i32: 1>} : vector<8x8xi32>
      %23 = arith.cmpi sle, %22, %21 : vector<8x8xi32>
      %24 = vector.shape_cast %23 : vector<8x8xi1> to vector<1x8x8xi1>
      %c0_16 = arith.constant 0 : index
      %c0_17 = arith.constant 0 : index
      %25 = vector.load %arg5[%c0_16, %c0_17] : memref<1x32xf32, #tpu.memory_space<vmem>>, vector<1x32xf32>
      %26 = vector.extract_strided_slice %18 {offsets = [0, 0], sizes = [8, 16], strides = [1, 1]} : vector<8x64xf32> to vector<8x16xf32>
      %27 = arith.truncf %26 : vector<8x16xf32> to vector<8x16xbf16>
      %28 = vector.shape_cast %27 : vector<8x16xbf16> to vector<1x8x16xbf16>
      %29 = vector.extract_strided_slice %19 {offsets = [0, 0], sizes = [8, 16], strides = [1, 1]} : vector<8x64xf32> to vector<8x16xf32>
      %30 = arith.truncf %29 : vector<8x16xf32> to vector<8x16xbf16>
      %31 = vector.shape_cast %30 : vector<8x16xbf16> to vector<1x8x16xbf16>
      %32 = vector.extract_strided_slice %20 {offsets = [0, 0], sizes = [8, 16], strides = [1, 1]} : vector<8x64xf32> to vector<8x16xf32>
      %33 = arith.truncf %32 : vector<8x16xf32> to vector<8x16xbf16>
      %34 = vector.shape_cast %33 : vector<8x16xbf16> to vector<1x8x16xbf16>
      "tpu.trace_start"() <{level = 10 : i32, message = "bqd,bkd->bqk"}> : () -> ()
      %cst_18 = arith.constant dense<0.000000e+00> : vector<1x8x8xf32>
      %35 = tpu.matmul %28, %31, %cst_18 {dimension_numbers = #tpu.dot_dimension_numbers<[2], [2], [1], [1], [0, 0, 0, 1, 1, 1], [0], [0]>} : vector<1x8x16xbf16>, vector<1x8x16xbf16>, vector<1x8x8xf32> -> vector<1x8x8xf32>
      %cst_19 = arith.constant -1.000000e+30 : f32
      "tpu.trace_stop"() : () -> ()
      %36 = vector.broadcast %cst_19 : f32 to vector<1x8x8xf32>
      %37 = arith.select %24, %35, %36 : vector<1x8x8xi1>, vector<1x8x8xf32>
      %cst_20 = arith.constant dense<0xFF800000> : vector<1x8xf32>
      %38 = vector.multi_reduction <maximumf>, %37, %cst_20 [2] : vector<1x8x8xf32> to vector<1x8xf32>
      %39 = vector.shape_cast %38 : vector<1x8xf32> to vector<1x8x1xf32>
      %40 = vector.broadcast %39 : vector<1x8x1xf32> to vector<1x8x8xf32>
      %41 = arith.subf %37, %40 : vector<1x8x8xf32>
      %42 = math.exp %41 : vector<1x8x8xf32>
      %cst_21 = arith.constant dense<0.000000e+00> : vector<1x8xf32>
      %43 = vector.multi_reduction <add>, %42, %cst_21 [2] : vector<1x8x8xf32> to vector<1x8xf32>
      %44 = vector.shape_cast %43 : vector<1x8xf32> to vector<1x8x1xf32>
      %45 = tpu.reciprocal %44 {approx = true} : vector<1x8x1xf32> -> vector<1x8x1xf32>
      %46 = vector.broadcast %45 : vector<1x8x1xf32> to vector<1x8x8xf32>
      %47 = arith.mulf %42, %46 : vector<1x8x8xf32>
      %48 = arith.truncf %47 : vector<1x8x8xf32> to vector<1x8x8xbf16>
      "tpu.trace_start"() <{level = 10 : i32, message = "bqk,bkd->bqd"}> : () -> ()
      %cst_22 = arith.constant dense<0.000000e+00> : vector<1x8x16xf32>
      %49 = tpu.matmul %48, %34, %cst_22 {dimension_numbers = #tpu.dot_dimension_numbers<[2], [1], [1], [2], [0, 0, 0, 1, 1, 2], [0], [0]>} : vector<1x8x8xbf16>, vector<1x8x16xbf16>, vector<1x8x16xf32> -> vector<1x8x16xf32>
      "tpu.trace_stop"() : () -> ()
      %50 = vector.shape_cast %49 : vector<1x8x16xf32> to vector<8x16xf32>
      %51 = arith.truncf %50 : vector<8x16xf32> to vector<8x16xbf16>
      %c0_23 = arith.constant 0 : index
      %c0_24 = arith.constant 0 : index
      %c0_25 = arith.constant 0 : index
      %52 = vector.load %arg4[%c0_23, %c0_24, %c0_25] : memref<4x16x32xbf16, #tpu.memory_space<vmem>>, vector<1x16x32xbf16>
      %53 = vector.shape_cast %52 : vector<1x16x32xbf16> to vector<16x32xbf16>
      %cst_26 = arith.constant dense<0.000000e+00> : vector<8x32xf32>
      %54 = tpu.matmul %51, %53, %cst_26 {dimension_numbers = #tpu.dot_dimension_numbers<[1], [0], [0], [1], [0, 0, 1, 1], [], []>} : vector<8x16xbf16>, vector<16x32xbf16>, vector<8x32xf32> -> vector<8x32xf32>
      %55 = vector.broadcast %25 : vector<1x32xf32> to vector<8x32xf32>
      %56 = arith.addf %55, %54 : vector<8x32xf32>
      %57 = vector.extract_strided_slice %18 {offsets = [0, 16], sizes = [8, 16], strides = [1, 1]} : vector<8x64xf32> to vector<8x16xf32>
      %58 = arith.truncf %57 : vector<8x16xf32> to vector<8x16xbf16>
      %59 = vector.shape_cast %58 : vector<8x16xbf16> to vector<1x8x16xbf16>
      %60 = vector.extract_strided_slice %19 {offsets = [0, 16], sizes = [8, 16], strides = [1, 1]} : vector<8x64xf32> to vector<8x16xf32>
      %61 = arith.truncf %60 : vector<8x16xf32> to vector<8x16xbf16>
      %62 = vector.shape_cast %61 : vector<8x16xbf16> to vector<1x8x16xbf16>
      %63 = vector.extract_strided_slice %20 {offsets = [0, 16], sizes = [8, 16], strides = [1, 1]} : vector<8x64xf32> to vector<8x16xf32>
      %64 = arith.truncf %63 : vector<8x16xf32> to vector<8x16xbf16>
      %65 = vector.shape_cast %64 : vector<8x16xbf16> to vector<1x8x16xbf16>
      "tpu.trace_start"() <{level = 10 : i32, message = "bqd,bkd->bqk"}> : () -> ()
      %cst_27 = arith.constant dense<0.000000e+00> : vector<1x8x8xf32>
      %66 = tpu.matmul %59, %62, %cst_27 {dimension_numbers = #tpu.dot_dimension_numbers<[2], [2], [1], [1], [0, 0, 0, 1, 1, 1], [0], [0]>} : vector<1x8x16xbf16>, vector<1x8x16xbf16>, vector<1x8x8xf32> -> vector<1x8x8xf32>
      %cst_28 = arith.constant -1.000000e+30 : f32
      "tpu.trace_stop"() : () -> ()
      %67 = vector.broadcast %cst_28 : f32 to vector<1x8x8xf32>
      %68 = arith.select %24, %66, %67 : vector<1x8x8xi1>, vector<1x8x8xf32>
      %cst_29 = arith.constant dense<0xFF800000> : vector<1x8xf32>
      %69 = vector.multi_reduction <maximumf>, %68, %cst_29 [2] : vector<1x8x8xf32> to vector<1x8xf32>
      %70 = vector.shape_cast %69 : vector<1x8xf32> to vector<1x8x1xf32>
      %71 = vector.broadcast %70 : vector<1x8x1xf32> to vector<1x8x8xf32>
      %72 = arith.subf %68, %71 : vector<1x8x8xf32>
      %73 = math.exp %72 : vector<1x8x8xf32>
      %cst_30 = arith.constant dense<0.000000e+00> : vector<1x8xf32>
      %74 = vector.multi_reduction <add>, %73, %cst_30 [2] : vector<1x8x8xf32> to vector<1x8xf32>
      %75 = vector.shape_cast %74 : vector<1x8xf32> to vector<1x8x1xf32>
      %76 = tpu.reciprocal %75 {approx = true} : vector<1x8x1xf32> -> vector<1x8x1xf32>
      %77 = vector.broadcast %76 : vector<1x8x1xf32> to vector<1x8x8xf32>
      %78 = arith.mulf %73, %77 : vector<1x8x8xf32>
      %79 = arith.truncf %78 : vector<1x8x8xf32> to vector<1x8x8xbf16>
      "tpu.trace_start"() <{level = 10 : i32, message = "bqk,bkd->bqd"}> : () -> ()
      %cst_31 = arith.constant dense<0.000000e+00> : vector<1x8x16xf32>
      %80 = tpu.matmul %79, %65, %cst_31 {dimension_numbers = #tpu.dot_dimension_numbers<[2], [1], [1], [2], [0, 0, 0, 1, 1, 2], [0], [0]>} : vector<1x8x8xbf16>, vector<1x8x16xbf16>, vector<1x8x16xf32> -> vector<1x8x16xf32>
      "tpu.trace_stop"() : () -> ()
      %81 = vector.shape_cast %80 : vector<1x8x16xf32> to vector<8x16xf32>
      %82 = arith.truncf %81 : vector<8x16xf32> to vector<8x16xbf16>
      %c1 = arith.constant 1 : index
      %c0_32 = arith.constant 0 : index
      %c0_33 = arith.constant 0 : index
      %83 = vector.load %arg4[%c1, %c0_32, %c0_33] : memref<4x16x32xbf16, #tpu.memory_space<vmem>>, vector<1x16x32xbf16>
      %84 = vector.shape_cast %83 : vector<1x16x32xbf16> to vector<16x32xbf16>
      %cst_34 = arith.constant dense<0.000000e+00> : vector<8x32xf32>
      %85 = tpu.matmul %82, %84, %cst_34 {dimension_numbers = #tpu.dot_dimension_numbers<[1], [0], [0], [1], [0, 0, 1, 1], [], []>} : vector<8x16xbf16>, vector<16x32xbf16>, vector<8x32xf32> -> vector<8x32xf32>
      %86 = arith.addf %56, %85 : vector<8x32xf32>
      %87 = vector.extract_strided_slice %18 {offsets = [0, 32], sizes = [8, 16], strides = [1, 1]} : vector<8x64xf32> to vector<8x16xf32>
      %88 = arith.truncf %87 : vector<8x16xf32> to vector<8x16xbf16>
      %89 = vector.shape_cast %88 : vector<8x16xbf16> to vector<1x8x16xbf16>
      %90 = vector.extract_strided_slice %19 {offsets = [0, 32], sizes = [8, 16], strides = [1, 1]} : vector<8x64xf32> to vector<8x16xf32>
      %91 = arith.truncf %90 : vector<8x16xf32> to vector<8x16xbf16>
      %92 = vector.shape_cast %91 : vector<8x16xbf16> to vector<1x8x16xbf16>
      %93 = vector.extract_strided_slice %20 {offsets = [0, 32], sizes = [8, 16], strides = [1, 1]} : vector<8x64xf32> to vector<8x16xf32>
      %94 = arith.truncf %93 : vector<8x16xf32> to vector<8x16xbf16>
      %95 = vector.shape_cast %94 : vector<8x16xbf16> to vector<1x8x16xbf16>
      "tpu.trace_start"() <{level = 10 : i32, message = "bqd,bkd->bqk"}> : () -> ()
      %cst_35 = arith.constant dense<0.000000e+00> : vector<1x8x8xf32>
      %96 = tpu.matmul %89, %92, %cst_35 {dimension_numbers = #tpu.dot_dimension_numbers<[2], [2], [1], [1], [0, 0, 0, 1, 1, 1], [0], [0]>} : vector<1x8x16xbf16>, vector<1x8x16xbf16>, vector<1x8x8xf32> -> vector<1x8x8xf32>
      %cst_36 = arith.constant -1.000000e+30 : f32
      "tpu.trace_stop"() : () -> ()
      %97 = vector.broadcast %cst_36 : f32 to vector<1x8x8xf32>
      %98 = arith.select %24, %96, %97 : vector<1x8x8xi1>, vector<1x8x8xf32>
      %cst_37 = arith.constant dense<0xFF800000> : vector<1x8xf32>
      %99 = vector.multi_reduction <maximumf>, %98, %cst_37 [2] : vector<1x8x8xf32> to vector<1x8xf32>
      %100 = vector.shape_cast %99 : vector<1x8xf32> to vector<1x8x1xf32>
      %101 = vector.broadcast %100 : vector<1x8x1xf32> to vector<1x8x8xf32>
      %102 = arith.subf %98, %101 : vector<1x8x8xf32>
      %103 = math.exp %102 : vector<1x8x8xf32>
      %cst_38 = arith.constant dense<0.000000e+00> : vector<1x8xf32>
      %104 = vector.multi_reduction <add>, %103, %cst_38 [2] : vector<1x8x8xf32> to vector<1x8xf32>
      %105 = vector.shape_cast %104 : vector<1x8xf32> to vector<1x8x1xf32>
      %106 = tpu.reciprocal %105 {approx = true} : vector<1x8x1xf32> -> vector<1x8x1xf32>
      %107 = vector.broadcast %106 : vector<1x8x1xf32> to vector<1x8x8xf32>
      %108 = arith.mulf %103, %107 : vector<1x8x8xf32>
      %109 = arith.truncf %108 : vector<1x8x8xf32> to vector<1x8x8xbf16>
      "tpu.trace_start"() <{level = 10 : i32, message = "bqk,bkd->bqd"}> : () -> ()
      %cst_39 = arith.constant dense<0.000000e+00> : vector<1x8x16xf32>
      %110 = tpu.matmul %109, %95, %cst_39 {dimension_numbers = #tpu.dot_dimension_numbers<[2], [1], [1], [2], [0, 0, 0, 1, 1, 2], [0], [0]>} : vector<1x8x8xbf16>, vector<1x8x16xbf16>, vector<1x8x16xf32> -> vector<1x8x16xf32>
      "tpu.trace_stop"() : () -> ()
      %111 = vector.shape_cast %110 : vector<1x8x16xf32> to vector<8x16xf32>
      %112 = arith.truncf %111 : vector<8x16xf32> to vector<8x16xbf16>
      %c2 = arith.constant 2 : index
      %c0_40 = arith.constant 0 : index
      %c0_41 = arith.constant 0 : index
      %113 = vector.load %arg4[%c2, %c0_40, %c0_41] : memref<4x16x32xbf16, #tpu.memory_space<vmem>>, vector<1x16x32xbf16>
      %114 = vector.shape_cast %113 : vector<1x16x32xbf16> to vector<16x32xbf16>
      %cst_42 = arith.constant dense<0.000000e+00> : vector<8x32xf32>
      %115 = tpu.matmul %112, %114, %cst_42 {dimension_numbers = #tpu.dot_dimension_numbers<[1], [0], [0], [1], [0, 0, 1, 1], [], []>} : vector<8x16xbf16>, vector<16x32xbf16>, vector<8x32xf32> -> vector<8x32xf32>
      %116 = arith.addf %86, %115 : vector<8x32xf32>
      %117 = vector.extract_strided_slice %18 {offsets = [0, 48], sizes = [8, 16], strides = [1, 1]} : vector<8x64xf32> to vector<8x16xf32>
      %118 = arith.truncf %117 : vector<8x16xf32> to vector<8x16xbf16>
      %119 = vector.shape_cast %118 : vector<8x16xbf16> to vector<1x8x16xbf16>
      %120 = vector.extract_strided_slice %19 {offsets = [0, 48], sizes = [8, 16], strides = [1, 1]} : vector<8x64xf32> to vector<8x16xf32>
      %121 = arith.truncf %120 : vector<8x16xf32> to vector<8x16xbf16>
      %122 = vector.shape_cast %121 : vector<8x16xbf16> to vector<1x8x16xbf16>
      %123 = vector.extract_strided_slice %20 {offsets = [0, 48], sizes = [8, 16], strides = [1, 1]} : vector<8x64xf32> to vector<8x16xf32>
      %124 = arith.truncf %123 : vector<8x16xf32> to vector<8x16xbf16>
      %125 = vector.shape_cast %124 : vector<8x16xbf16> to vector<1x8x16xbf16>
      "tpu.trace_start"() <{level = 10 : i32, message = "bqd,bkd->bqk"}> : () -> ()
      %cst_43 = arith.constant dense<0.000000e+00> : vector<1x8x8xf32>
      %126 = tpu.matmul %119, %122, %cst_43 {dimension_numbers = #tpu.dot_dimension_numbers<[2], [2], [1], [1], [0, 0, 0, 1, 1, 1], [0], [0]>} : vector<1x8x16xbf16>, vector<1x8x16xbf16>, vector<1x8x8xf32> -> vector<1x8x8xf32>
      %cst_44 = arith.constant -1.000000e+30 : f32
      "tpu.trace_stop"() : () -> ()
      %127 = vector.broadcast %cst_44 : f32 to vector<1x8x8xf32>
      %128 = arith.select %24, %126, %127 : vector<1x8x8xi1>, vector<1x8x8xf32>
      %cst_45 = arith.constant dense<0xFF800000> : vector<1x8xf32>
      %129 = vector.multi_reduction <maximumf>, %128, %cst_45 [2] : vector<1x8x8xf32> to vector<1x8xf32>
      %130 = vector.shape_cast %129 : vector<1x8xf32> to vector<1x8x1xf32>
      %131 = vector.broadcast %130 : vector<1x8x1xf32> to vector<1x8x8xf32>
      %132 = arith.subf %128, %131 : vector<1x8x8xf32>
      %133 = math.exp %132 : vector<1x8x8xf32>
      %cst_46 = arith.constant dense<0.000000e+00> : vector<1x8xf32>
      %134 = vector.multi_reduction <add>, %133, %cst_46 [2] : vector<1x8x8xf32> to vector<1x8xf32>
      %135 = vector.shape_cast %134 : vector<1x8xf32> to vector<1x8x1xf32>
      %136 = tpu.reciprocal %135 {approx = true} : vector<1x8x1xf32> -> vector<1x8x1xf32>
      %137 = vector.broadcast %136 : vector<1x8x1xf32> to vector<1x8x8xf32>
      %138 = arith.mulf %133, %137 : vector<1x8x8xf32>
      %139 = arith.truncf %138 : vector<1x8x8xf32> to vector<1x8x8xbf16>
      "tpu.trace_start"() <{level = 10 : i32, message = "bqk,bkd->bqd"}> : () -> ()
      %cst_47 = arith.constant dense<0.000000e+00> : vector<1x8x16xf32>
      %140 = tpu.matmul %139, %125, %cst_47 {dimension_numbers = #tpu.dot_dimension_numbers<[2], [1], [1], [2], [0, 0, 0, 1, 1, 2], [0], [0]>} : vector<1x8x8xbf16>, vector<1x8x16xbf16>, vector<1x8x16xf32> -> vector<1x8x16xf32>
      "tpu.trace_stop"() : () -> ()
      %141 = vector.shape_cast %140 : vector<1x8x16xf32> to vector<8x16xf32>
      %142 = arith.truncf %141 : vector<8x16xf32> to vector<8x16xbf16>
      %c3 = arith.constant 3 : index
      %c0_48 = arith.constant 0 : index
      %c0_49 = arith.constant 0 : index
      %143 = vector.load %arg4[%c3, %c0_48, %c0_49] : memref<4x16x32xbf16, #tpu.memory_space<vmem>>, vector<1x16x32xbf16>
      %144 = vector.shape_cast %143 : vector<1x16x32xbf16> to vector<16x32xbf16>
      %cst_50 = arith.constant dense<0.000000e+00> : vector<8x32xf32>
      %145 = tpu.matmul %142, %144, %cst_50 {dimension_numbers = #tpu.dot_dimension_numbers<[1], [0], [0], [1], [0, 0, 1, 1], [], []>} : vector<8x16xbf16>, vector<16x32xbf16>, vector<8x32xf32> -> vector<8x32xf32>
      %146 = arith.addf %116, %145 : vector<8x32xf32>
      %c0_51 = arith.constant 0 : index
      %c0_52 = arith.constant 0 : index
      %147 = vector.load %arg9[%c0_51, %c0_52] : memref<8x32xf32, #tpu.memory_space<vmem>>, vector<8x32xf32>
      tpu.vector_store %arg9[%c0_51, %c0_52], %146 {strides = array<i32>} : memref<8x32xf32, #tpu.memory_space<vmem>>, vector<8x32xf32>,
    } else {
    }
    %c0 = arith.constant 0 : index
    %c0_1 = arith.constant 0 : index
    %3 = vector.load %arg9[%c0, %c0_1] : memref<8x32xf32, #tpu.memory_space<vmem>>, vector<8x32xf32>
    %4 = arith.truncf %3 : vector<8x32xf32> to vector<8x32xbf16>
    %c0_2 = arith.constant 0 : index
    %c0_3 = arith.constant 0 : index
    %5 = vector.load %arg6[%c0_2, %c0_3] : memref<32x128xbf16, #tpu.memory_space<vmem>>, vector<32x128xbf16>
    %cst = arith.constant dense<0.000000e+00> : vector<8x128xf32>
    %6 = tpu.matmul %4, %5, %cst {dimension_numbers = #tpu.dot_dimension_numbers<[1], [0], [0], [1], [0, 0, 1, 1], [], []>} : vector<8x32xbf16>, vector<32x128xbf16>, vector<8x128xf32> -> vector<8x128xf32>
    %c0_4 = arith.constant 0 : index
    %c0_5 = arith.constant 0 : index
    %7 = vector.load %arg7[%c0_4, %c0_5] : memref<1x128xf32, #tpu.memory_space<vmem>>, vector<1x128xf32>
    %8 = vector.broadcast %7 : vector<1x128xf32> to vector<8x128xf32>
    %9 = arith.addf %6, %8 : vector<8x128xf32>
    %10 = vector.shape_cast %9 : vector<8x128xf32> to vector<1x8x128xf32>
    %c0_6 = arith.constant 0 : index
    %c0_7 = arith.constant 0 : index
    %c0_8 = arith.constant 0 : index
    %11 = vector.load %arg8[%c0_6, %c0_7, %c0_8] : memref<1x8x128xf32, #tpu.memory_space<vmem>>, vector<1x8x128xf32>
    tpu.vector_store %arg8[%c0_6, %c0_7, %c0_8], %10 {strides = array<i32>} : memref<1x8x128xf32, #tpu.memory_space<vmem>>, vector<1x8x128xf32>,
    return
  }
  func.func @transform_0(%arg0: i32, %arg1: i32) -> (i32, i32, i32) {
    %c0_i32 = arith.constant 0 : i32
    %c0_i32_0 = arith.constant 0 : i32
    %c0_i32_1 = arith.constant 0 : i32
    return %arg0, %c0_i32, %c0_i32_0 : i32, i32, i32
  }
  func.func @transform_1(%arg0: i32, %arg1: i32) -> (i32, i32) {
    %c0_i32 = arith.constant 0 : i32
    %c0_i32_0 = arith.constant 0 : i32
    %c0_i32_1 = arith.constant 0 : i32
    return %c0_i32, %c0_i32_0 : i32, i32
  }
  func.func @transform_2(%arg0: i32, %arg1: i32) -> (i32, i32, i32) {
    %c0_i32 = arith.constant 0 : i32
    %c0_i32_0 = arith.constant 0 : i32
    %c0_i32_1 = arith.constant 0 : i32
    %c0_i32_2 = arith.constant 0 : i32
    return %c0_i32, %c0_i32_0, %c0_i32_1 : i32, i32, i32
  }
  func.func @transform_3(%arg0: i32, %arg1: i32) -> (i32, i32) {
    %c0_i32 = arith.constant 0 : i32
    %c0_i32_0 = arith.constant 0 : i32
    %c0_i32_1 = arith.constant 0 : i32
    return %c0_i32, %c0_i32_0 : i32, i32
  }
  func.func @transform_4(%arg0: i32, %arg1: i32) -> (i32, i32) {
    %c0_i32 = arith.constant 0 : i32
    %c0_i32_0 = arith.constant 0 : i32
    return %c0_i32, %arg1 : i32, i32
  }
  func.func @transform_5(%arg0: i32, %arg1: i32) -> (i32, i32) {
    %c0_i32 = arith.constant 0 : i32
    %c0_i32_0 = arith.constant 0 : i32
    return %c0_i32, %arg1 : i32, i32
  }
  func.func @transform_6(%arg0: i32, %arg1: i32) -> (i32, i32, i32) {
    %c0_i32 = arith.constant 0 : i32
    %c0_i32_0 = arith.constant 0 : i32
    return %arg0, %c0_i32, %arg1 : i32, i32, i32
  }
}

</mosaic_0001>

<bundles_post_ra>
// kernel: tpu_custom_call.1
= control target key start
LH: loop header
LB: loop body
LE: loop exit
PB: predicated region body
PF: predicated region fallthrough
CT: control target
= control target key end

     0   :  { %s2233_s0 = inlined_call_operand.hbm [shape: bf16[2,8,32], index: 0, kind: input, shape index: {}]   ;;  %s2234_s1 = inlined_call_operand.hbm [shape: bf16[32,384], index: 1, kind: input, shape index: {}]   ;;  %s2235_s2 = inlined_call_operand.hbm [shape: bf16[4,16,32], index: 2, kind: input, shape index: {}]   ;;  %s2236_s3 = inlined_call_operand.vmem [shape: f32[1,32], index: 3, kind: input, shape index: {}]   ;;  %s2237_s4 = inlined_call_operand.hbm [shape: bf16[32,128], index: 4, kind: input, shape index: {}]   ;;  %s2238_s5 = inlined_call_operand.vmem [shape: f32[1,128], index: 5, kind: input, shape index: {}]   ;;  %s2239_s6 = inlined_call_operand.hbm [shape: f32[2,8,128], index: 6, kind: output, shape index: {}]  }
   0x1   :  { %2243 = sst [smem:[#allocation16_spill]] %s2234_s1 }
   0x2   :  { %2244 = sst [smem:[#allocation17_spill]] %s2235_s2 }
   0x3   :  { %2245 = sst [smem:[#allocation18_spill]] %s2237_s4 }
   0x4   :  { %11 = vsyncpa [#allocation4], 0 }
   0x5   :  { %13 = vsyncpa [#allocation4 + $0x1], 0 }
   0x6   :  { %14 = vsyncpa [#allocation7], 0 }
   0x7   :  { %15 = vsyncpa [#allocation10], 0 }
   0x8   :  { %16 = vsyncpa [#allocation5], 0 }
   0x9   :  { %18 = vsyncpa [#allocation5 + $0x1], 0  ;;  %s1906_s21 = smov 0   ;;  %s1908_s22 = smov 0  }
   0xa   :  { %s1910_s23 = smov 0   ;;  %s1912_s24 = smov 0  }
   0xb   :  { %s1914_s25 = smov 0   ;;  %s1916_s26 = smov 0  }
   0xc LB: > { %s1360_s27 = sadd.s32 4294967295, %s1854_s26   ;;  %s1361_s28 = sadd.s32 4294967294, %s1854_s26   ;;  %s1854_s26 = sphi %s1916_s26, %s24_s26   ;;  %s1850_s25 = sphi %s1914_s25, %s2266_s25   ;;  %s1846_s24 = sphi %s1912_s24, %s2265_s24   ;;  %s1842_s23 = sphi %s1910_s23, %s2264_s23   ;;  %s1838_s22 = sphi %s1908_s22, %s2263_s22   ;;  %s1834_s21 = sphi %s1906_s21, %s2262_s21  }
   0xd   : > { %p56_p0 = scmp.ne.s32.totalorder %s1838_s22, %s1834_s21  ;;  %p1940_p1 = scmp.eq.s32.totalorder %s1360_s27, 0 }
   0xe   : > { %p1944_p2 = scmp.eq.s32.totalorder %s1360_s27, 1  ;;  %p203_p3 = scmp.eq.s32.totalorder %s1361_s28, 1 }
   0xf   : > { %s2246_s29 = scalar_select %p1940_p1, 1, 0 }
  0x10   : > { %p1950_p4 = por %p1940_p1, %p56_p0  ;;  %p1362_p5 = scmp.ge.s32.totalorder %s1854_s26, 1 }
  0x11   : > { %p1955_p6 = por %p203_p3, %p56_p0  ;;  %p210_p7 = scmp.lt.s32.totalorder %s1854_s26, 3 }
  0x12   : > { %s2248_s7 = scalar_select %p1950_p4, 1, 0 }
  0x13   : > { %s2249_s8 = scalar_select %p1955_p6, 1, 0 }
  0x14   : > { %p1960_p8 = pnand %p1362_p5, %p210_p7  ;;  %s1856_s10 = smov [#allocation6]  }
  0x15   : > { %s222_s11 = sshll.u32 %s1856_s10, 4  ;;  %s1857_s13 = smov [#allocation8]   ;;  %s223_s11 = int_to_ptr.vmem [resolvable:$true] %s222_s11 }
  0x16   : > { %p1543_p9 = pneg %p1960_p8  ;;  %s235_s14 = sshll.u32 %s1857_s13, 4  ;;  %s236_s14 = int_to_ptr.vmem [resolvable:$true] %s235_s14 }
  0x17   : > { %s1671_s15 = scalar_lea.vmem %s223_s11, 768  ;;  %p1679_p5 = scmp.lt.s32.totalorder %s223_s11, %s223_s11 }
  0x18   : > { %p1969_p11 = pnand %p1543_p9, %p1940_p1  ;;  %p1672_p13 = scmp.ne.s32.totalorder %s223_s11, %s1671_s15 }
  0x19   : > { %p1680_p7 = scmp.lt.s32.totalorder %s1671_s15, %s1671_s15 }
  0x1a   : > { %p1662_p12 = pneg %p1969_p11 }
  0x1b   : > { %p1681_p10 = por %p1680_p7, %p1679_p5 }
  0x1c   : > { %p1674_p0 = pnand %p1672_p13, %p1662_p12 }
  0x1e   : > { %p1675_p3 = pneg %p1674_p0 }
  0x20   : > { %p1682_p9 = pnand %p1681_p10, %p1675_p3 }
  0x22   : > { %1685 = shalt.err (!%p1682_p9)
}
  0x23   : > { %s1858_s16 = smov 192   ;;  %s1859_s17 = smov 12  }
  0x24   : > { %s2252_s1 = sld [smem:[#allocation16_spill]]  ;;  %s1697_s20 = scalar_lea.vmem %s236_s14, 512 }
  0x25   : > { %p1698_p6 = scmp.ne.s32.totalorder %s236_s14, %s1697_s20  ;;  %p1705_p1 = scmp.lt.s32.totalorder %s236_s14, %s236_s14 }
  0x26   : > { %p1706_p4 = scmp.lt.s32.totalorder %s1697_s20, %s1697_s20 }
  0x27   : > { %p1700_p13 = pnand %p1698_p6, %p1662_p12 }
  0x28   : > { %p1707_p5 = por %p1706_p4, %p1705_p1 }
  0x29   : > { %p1701_p0 = pneg %p1700_p13 }
  0x2a   : > { %1546 = dma.hbm_to_vmem [thread:$0]  (!%p1969_p11), %s2252_s1, 768, %s223_s11, [#allocation7], %s1858_s16, %s1858_s16, %s1859_s17  }
  0x2b   : > { %p1708_p10 = pnand %p1707_p5, %p1701_p0 }
  0x2d   : > { %1711 = shalt.err (!%p1708_p10)
}
  0x2e   : > { %s1860_s27 = smov 64   ;;  %s1861_s28 = smov 4  }
  0x2f   : > { %s2253_s2 = sld [smem:[#allocation17_spill]]  ;;  %s1862_s11 = smov [#allocation9]  }
  0x30   : > { %s253_s15 = sshll.u32 %s1862_s11, 4  ;;  %s254_s15 = int_to_ptr.vmem [resolvable:$true] %s253_s15 }
  0x31   : > { %s1723_s16 = scalar_lea.vmem %s254_s15, 256  ;;  %p1731_p4 = scmp.lt.s32.totalorder %s254_s15, %s254_s15 }
  0x32   : > { %p1724_p6 = scmp.ne.s32.totalorder %s254_s15, %s1723_s16  ;;  %p1732_p7 = scmp.lt.s32.totalorder %s1723_s16, %s1723_s16 }
  0x34   : > { %p1726_p3 = pnand %p1724_p6, %p1662_p12  ;;  %p1733_p9 = por %p1732_p7, %p1731_p4 }
  0x35   : > { %1549 = dma.hbm_to_vmem [thread:$0]  (!%p1969_p11), %s2253_s2, 512, %s236_s14, [#allocation7], %s1860_s27, %s1860_s27, %s1861_s28  }
  0x36   : > { %p1727_p1 = pneg %p1726_p3 }
  0x38   : > { %p1734_p13 = pnand %p1733_p9, %p1727_p1 }
  0x3a   : > { %1737 = shalt.err (!%p1734_p13)
}
  0x3b   : > { %s2254_s4 = sld [smem:[#allocation18_spill]]  ;;  %s36_s14 = sadd.s32 1, %s1850_s25 }
  0x3c   : > { %p38_p12 = scmp.ge.s32.totalorder %s36_s14, 2  ;;  %s43_s19 = sadd.s32 1, %s1842_s23 }
  0x3d   : > { %p50_p0 = scmp.ne.s32.totalorder %s1842_s23, %s1838_s22  ;;  %p51_p5 = scmp.eq.s32.totalorder %s1854_s26, 0 }
  0x3e   : > { %s2268_s14 = smov (%p38_p12, %s36_s14), 0  ;;  %s1369_s11 = sshll.u32 %s1850_s25, 6 }
  0x3f   : > { %p2006_p10 = por %p51_p5, %p50_p0  ;;  %p2012_p6 = por %p1944_p2, %p50_p0 }
  0x40   : > { %s40_s10 = ssub.s32 %s1850_s25, %s2268_s14  ;;  %s282_s17 = scalar_lea.hbm %s2233_s0, %s1369_s11 }
  0x41   : > { %1552 = dma.hbm_to_vmem [thread:$0]  (!%p1969_p11), %s2254_s4, 256, %s254_s15, [#allocation10], %s1860_s27, %s1860_s27, %s1861_s28  }
  0x42   : > { %p1564_p11 = scmp.lt.s32.totalorder %s1854_s26, 2  ;;  %p41_p3 = scmp.eq.s32.totalorder %s40_s10, 0 }
  0x43   : > { %s273_s27 = sand.u32 1, %s1842_s23  }
  0x44   : > { %s1368_s28 = sshll.u32 %s273_s27, 2  ;;  %p2029_p2 = pnand %p1564_p11, %p2006_p10 }
  0x45   : > { %s2021_s13 = scalar_select %p41_p3, %s1842_s23, %s43_s19  }
  0x46   : > { %s277_s18 = scalar_lea.vmem [#allocation3], %s1368_s28  ;;  %s274_s2 = scalar_lea.sflag [#allocation4], %s273_s27 }
  0x47   : > { %s284_s1 = sshll.u32 %s277_s18, 4  ;;  %p1740_p1 = pneg %p2029_p2  ;;  %s285_s1 = int_to_ptr.vmem [resolvable:$true] %s284_s1 }
  0x48   : > { %s1751_s10 = scalar_lea.vmem %s285_s1, 64  ;;  %s1863_s19 = smov [#allocation3]  }
  0x49   : > { %p1752_p4 = scmp.ne.s32.totalorder %s285_s1, %s1751_s10  ;;  %s1756_s4 = sshll.u32 %s1863_s19, 4  ;;  %s1757_s4 = int_to_ptr.vmem [resolvable:$false] %s1756_s4 }
  0x4a   : > { %s1758_s11 = scalar_lea.vmem %s1757_s4, 128  ;;  %p1759_p13 = scmp.lt.s32.totalorder %s285_s1, %s1757_s4 }
  0x4b   : > { %p1754_p7 = pnand %p1752_p4, %p1740_p1  ;;  %p1760_p12 = scmp.lt.s32.totalorder %s1758_s11, %s1751_s10 }
  0x4d   : > { %p1755_p9 = pneg %p1754_p7  ;;  %p1761_p0 = por %p1760_p12, %p1759_p13 }
  0x4f   : > { %p1762_p5 = pnand %p1761_p0, %p1755_p9 }
  0x51   : > { %1765 = shalt.err (!%p1762_p5)
}
  0x52   : > { %1556 = dma.hbm_to_vmem [thread:$0]  (!%p2029_p2), %s282_s17, 64, %s285_s1, %s274_s2  }
  0x53   : > { %293 = sbr.rel (%p1960_p8) target bundleno = 2973 (0xb9d), region = 44  ;;  %s2040_s12 = sand.u32 (!%p1960_p8), 1, %s1838_s22  }
  0x54   : > { %s1371_s27 = sshll.u32 (!%p1960_p8), %s2040_s12, 2  ;;  %s296_s28 = scalar_lea.sflag (!%p1960_p8), [#allocation4], %s2040_s12 }
  0x55   : > { %s299_s15 = scalar_lea.vmem (!%p1960_p8), [#allocation3], %s1371_s27  ;;  %p2258_p10 = scmp.ne.s32.totalorder (!%p1960_p8), %s2248_s7, 0 }
  0x58   : > { %1817 = dma.done.wait (%p2258_p10), %s296_s28, 64  }
  0x59   : > { %1819 = vsyncadd (%p2258_p10), %s296_s28, 4294967232  ;;  %p2259_p11 = scmp.ne.s32.totalorder %s2246_s29, 0 }
  0x5b   : > { %1821 = dma.done.wait (%p2259_p11), [#allocation7], 1280  }
  0x5c   : > { %1823 = vsyncadd (%p2259_p11), [#allocation7], 4294966016 }
  0x5d   : > { %1825 = dma.done.wait (%p2259_p11), [#allocation10], 256  }
  0x5e   : > { %1827 = vsyncadd (%p2259_p11), [#allocation10], 4294967040  ;;  %v1864_v0 = vmov 0   ;;  %v1630_v1 = vld [vmem:[#allocation6 + $0x1c] ss:$12 sps:$4 sm:$0xff]   ;;  %vm392_vm0 = vcmask 261120   ;;  %v478_v17 = vlaneseq }
  0x5f   : > { %428 = vmatprep.mubr.bf16.mxu0 %v1864_v0  ;;  %v1632_v2 = vld [vmem:[#allocation6 + $0x18] ss:$12 sps:$4 sm:$0xff]   ;;  %408 = vmatprep.subr.bf16.mxu0 %v1630_v1  ;;  %v1635_v4 = vld [vmem:[#allocation6] ss:$12 sps:$4 sm:$0xff]   ;;  %v1865_v6 = vmov 0.0   ;;  %vm1866_vm1 = vmmov 0  }
  0x60   : > { %v1633_v3 = vld [vmem:[#allocation6 + $0x4] ss:$12 sps:$4 sm:$0xff]   ;;  %409 = vmatpush1.bf16.msra.mxu0 %v1632_v2  ;;  %v351_v5 = vld [vmem:[%s299_s15] sm:$0xf]  ;;  %1439 = vmatprep.subr.bf16.mxu1 %v1865_v6  ;;  %vm487_vm2 = vcmask 130048   ;;  %s1867_s1 = smov 112  }
  0x61   : > { %410 = vmatprep.subr.bf16.mxu0 %v1633_v3  ;;  %1443 = vmatprep.mubr.msk.bf16.mxu1 %vm1866_vm1, %v1865_v6  ;;  %v1636_v15 = vld [vmem:[#allocation6 + $0x20] ss:$12 sps:$4 sm:$0xff]   ;;  %v1637_v16 = vld [vmem:[#allocation6 + $0x8] ss:$12 sps:$4 sm:$0xff]   ;;  %v2083_v18 = vshrl.u32 %v478_v17, 7  ;;  %v2085_v19 = vand.u32 127, %v478_v17 }
  0x62   : > { %1440 = vmatpush3.bf16.msra.mxu1 %v1636_v15  ;;  %vm535_vm4 = vcmask 64512   ;;  %vm551_vm5 = vcmask 1043456   ;;  %v1638_v44 = vld [vmem:[#allocation8] sm:$0xff]   ;;  %s1868_s2 = smov 96   ;;  %v1639_v3 = vld [vmem:[#allocation8 + $0x8] sm:$0xff]   ;;  %s1869_s4 = smov 80  }
  0x63   : > { %1441 = vmatprep.subr.bf16.mxu1 %v1865_v6  ;;  %vm482_vm3 = vcmp.le.s32.totalorder %v2085_v19, %v2083_v18  ;;  %s1375_s9 = sshll.u32 %s2040_s12, 3  ;;  %s1406_s18 = sshll.u32 %s1846_s24, 7 }
  0x64   : > { %411 = vmatpush1.bf16.msra.mxu0 %v1635_v4  ;;  %s342_s30 = scalar_lea.vmem [#allocation11], %s1375_s9  ;;  %s2185_s27 = scalar_lea.hbm %s2239_s6, %s1406_s18 }
  0x65   : > { %1447 = vmatprep.subr.bf16.mxu0 %v1865_v6  ;;  %s1238_s10 = sshll.u32 %s342_s30, 4  ;;  %s1224_s28 = scalar_lea.sflag [#allocation5], %s2040_s12  ;;  %s2187_s10 = int_to_ptr.vmem [resolvable:$true] %s1238_s10 }
  0x66   : > { %1442 = vmatpush3.bf16.msra.mxu1 %v1637_v16  ;;  %s1766_s15 = scalar_lea.vmem %s2187_s10, 128  ;;  %s1870_s24 = smov [#allocation11]  }
  0x67   : > { %1382 = vmatmul.mubr.msk.bf16.vlgmr.msra.gmra.mxu0 %vm392_vm0, %v351_v5  ;;  %1453 = vmatprep.subr.bf16.mxu1 %v1865_v6  ;;  %p1767_p8 = scmp.ne.s32.totalorder %s2187_s10, %s1766_s15 }
  0x68   : > { %1449 = vmatprep.mubr.msk.bf16.mxu0 %vm1866_vm1, %v1865_v6 }
  0x69   : > { %1444 = vmatmul.mubr.msk.bf16.vlgmr.msra.gmra.mxu1 %vm392_vm0, %v351_v5  ;;  %p1768_p3 = pnand %p1767_p8, %p2012_p6 }
  0x6a   : > { %1455 = vmatprep.mubr.msk.bf16.mxu1 %vm1866_vm1, %v1865_v6 }
  0x6b   : > { %p1769_p2 = pneg %p1768_p3 }
 0x127   : > { %v430_v7 = vpop.f32.mrf.mxu0 }
 0x128   : > { %v477_v9 = vmul.f32 0.25, %v430_v7 }
 0x129   : > { %v432_v8 = vpop.f32.mrf.mxu0  ;;  %v471_v31 = vpop.f32.mrf.mxu1 }
 0x12a   : > { %v2063_v10 = vpack.c.bf16 %v432_v8, %v432_v8  ;;  %v2069_v14 = vpack.c.bf16 %v477_v9, %v477_v9  ;;  %v2094_v32 = vpack.c.bf16 %v471_v31, %v471_v31 }
 0x12b   : > { %v434_v11 = vpop.f32.mrf.mxu0  ;;  %v1445_v33 = vpop.f32.mrf.mxu1 }
 0x12c   : > { %658 = vrot.lane.b32.xlu1 %v2063_v10, %s1867_s1  ;;  %v492_v12 = vsel %vm487_vm2, %v2063_v10, 0  ;;  %v553_v34 = vsel %vm551_vm5, %v2094_v32, 0 }
 0x12d   : > { %v435_v13 = vpop.f32.mrf.mxu0  ;;  %1448 = vmatpush3.bf16.xpose.msra.mxu0 %v492_v12  ;;  %v474_v35 = vpop.f32.mrf.mxu1  ;;  %1454 = vmatpush3.bf16.msra.mxu1 %v553_v34 }
 0x12e   : > { %1459 = vmatprep.subr.bf16.mxu0 %v1865_v6  ;;  %1465 = vmatprep.subr.bf16.mxu1 %v1865_v6  ;;  %v1388_v35 = vld [vmem:[%s2236_s3] ss:$0 sm:$0xff] }
 0x12f   : > { %v1446_v36 = vpop.f32.mrf.mxu1 }
 0x130   : > { %655 = vrot.lane.b32.xlu1 %v2069_v14, %s1867_s1 }
 0x134   : > { %1450 = vmatmul.mubr.msk.bf16.vlgmr.msra.gmra.mxu0 %vm487_vm2, %v2069_v14 }
 0x135   : > { %1461 = vmatprep.mubr.msk.bf16.mxu0 %vm1866_vm1, %v1865_v6  ;;  %1460 = vmatpush3.bf16.msra.mxu0 %v1638_v44 }
 0x136   : > { %1471 = vmatprep.subr.bf16.mxu0 %v1865_v6 }
 0x19e   : > { %v659_v40 = vpop.permute.xlu1 %658 }
 0x19f   : > { %v664_v42 = vsel %vm487_vm2, %v659_v40, 0 }
 0x1a2   : > { %v656_v43 = vpop.permute.xlu1 %655 }
 0x1f4   : > { %v528_v20 = vpop.f32.mrf.mxu0 }
 0x1f5   : > { %v534_v21 = vsel %vm482_vm3, %v528_v20, -1e+30 }
 0x1f6   : > { %v1451_v22 = vpop.f32.mrf.mxu0  ;;  %v536_v23 = vsel %vm535_vm4, %v534_v21, -inf }
 0x1f7   : > { %537 = vmax.xlane.f32.xlu0 %v536_v23 }
 0x1f8   : > { %v531_v24 = vpop.f32.mrf.mxu0 }
 0x1fa   : > { %v1452_v25 = vpop.f32.mrf.mxu0 }
 0x280   : > { %v538_v26 = vpop.xlane.xlu0 %537 }
 0x281   : > { %v539_v27 = vsub.f32 %v534_v21, %v538_v26 }
 0x283   : > { %v540_v28 = vmul.f32 1.442695, %v539_v27 }
 0x285   : > { %1644 = vpow2.f32 %v540_v28 }
 0x292   : > { %v1645_v29 = vpop.eup %1644 }
 0x293   : > { %v542_v30 = vsel %vm535_vm4, %v1645_v29, 0.0 }
 0x294   : > { %543 = vadd.xlane.f32.xlu0 %v542_v30 }
 0x31d   : > { %v544_v37 = vpop.xlane.xlu0 %543 }
 0x31e   : > { %1646 = vrcp.f32 %v544_v37 }
 0x32b   : > { %v1647_v38 = vpop.eup %1646 }
 0x32c   : > { %v546_v39 = vmul.f32 %v1647_v38, %v1645_v29 }
 0x32e   : > { %v547_v41 = vpack.c.bf16 %v546_v39, %v546_v39 }
 0x330   : > { %1456 = vmatmul.mubr.msk.bf16.vlgmr.msra.gmra.mxu1 %vm535_vm4, %v547_v41 }
 0x331   : > { %1466 = vmatpush3.bf16.xpose.msra.mxu1 %v664_v42  ;;  %1467 = vmatprep.mubr.msk.bf16.mxu1 %vm1866_vm1, %v1865_v6 }
 0x332   : > { %1477 = vmatprep.subr.bf16.mxu1 %v1865_v6 }
 0x338   : > { %1468 = vmatmul.mubr.msk.bf16.vlgmr.msra.gmra.mxu1 %vm487_vm2, %v656_v43 }
 0x339   : > { %1479 = vmatprep.mubr.msk.bf16.mxu1 %vm1866_vm1, %v1865_v6  ;;  %1478 = vmatpush3.bf16.msra.mxu1 %v1639_v3 }
 0x33a   : > { %1489 = vmatprep.subr.bf16.mxu1 %v1865_v6 }
 0x3f0   : > { %v589_v45 = vpop.f32.mrf.mxu1 }
 0x3f1   : > { %v595_v46 = vpack.c.bf16 %v589_v45, %v589_v45 }
 0x3f2   : > { %v1457_v47 = vpop.f32.mrf.mxu1 }
 0x3f3   : > { %1462 = vmatmul.mubr.msk.bf16.vlgmr.msra.gmra.mxu0 %vm487_vm2, %v595_v46  ;;  %v1640_v47 = vld [vmem:[#allocation8 + $0x10] sm:$0xff]  }
 0x3f4   : > { %v592_v48 = vpop.f32.mrf.mxu1  ;;  %1473 = vmatprep.mubr.msk.bf16.mxu0 %vm1866_vm1, %v1865_v6 }
 0x3f6   : > { %v1458_v49 = vpop.f32.mrf.mxu1 }
 0x3f8   : > { %v700_v50 = vpop.f32.mrf.mxu1 }
 0x3f9   : > { %v706_v51 = vsel %vm482_vm3, %v700_v50, -1e+30 }
 0x3fa   : > { %v1469_v52 = vpop.f32.mrf.mxu1  ;;  %v707_v53 = vsel %vm535_vm4, %v706_v51, -inf }
 0x3fb   : > { %708 = vmax.xlane.f32.xlu0 %v707_v53 }
 0x3fc   : > { %v703_v54 = vpop.f32.mrf.mxu1 }
 0x3fe   : > { %v1470_v55 = vpop.f32.mrf.mxu1 }
 0x411   : > { %720 = vrot.lane.b32.xlu0 %v2094_v32, %s1867_s1  ;;  %s1770_s1 = sshll.u32 %s1870_s24, 4  ;;  %s1771_s1 = int_to_ptr.vmem [resolvable:$false] %s1770_s1 }
 0x412   : > { %p1773_p1 = scmp.lt.s32.totalorder %s2187_s10, %s1771_s1 }
 0x415   : > { %824 = vrot.lane.b32.xlu0 %v2063_v10, %s1868_s2 }
 0x419   : > { %822 = vrot.lane.b32.xlu0 %v2069_v14, %s1868_s2 }
 0x484   : > { %v709_v56 = vpop.xlane.xlu0 %708 }
 0x485   : > { %v710_v57 = vsub.f32 %v706_v51, %v709_v56 }
 0x487   : > { %v711_v58 = vmul.f32 1.442695, %v710_v57 }
 0x488   : > { %v721_v59 = vpop.permute.xlu0 %720 }
 0x489   : > { %1648 = vpow2.f32 %v711_v58  ;;  %v726_v60 = vsel %vm551_vm5, %v721_v59, 0 }
 0x48a   : > { %1472 = vmatpush3.bf16.msra.mxu0 %v726_v60 }
 0x48b   : > { %1483 = vmatprep.subr.bf16.mxu0 %v1865_v6 }
 0x48c   : > { %v825_v8 = vpop.permute.xlu0 %824 }
 0x48d   : > { %v830_v11 = vsel %vm487_vm2, %v825_v8, 0 }
 0x490   : > { %v823_v12 = vpop.permute.xlu0 %822 }
 0x496   : > { %v1649_v61 = vpop.eup %1648 }
 0x497   : > { %v713_v62 = vsel %vm535_vm4, %v1649_v61, 0.0 }
 0x498   : > { %714 = vadd.xlane.f32.xlu1 %v713_v62 }
 0x4a9   : > { %885 = vrot.lane.b32.xlu1 %v2094_v32, %s1868_s2  ;;  %s1772_s2 = scalar_lea.vmem %s1771_s1, 256 }
 0x4aa   : > { %p1774_p4 = scmp.lt.s32.totalorder %s1772_s2, %s1766_s15 }
 0x4ac   : > { %p1775_p7 = por %p1774_p4, %p1773_p1 }
 0x4ae   : > { %p1776_p9 = pnand %p1775_p7, %p1769_p2 }
 0x4b3   : > { %v641_v63 = vpop.f32.mrf.mxu0 }
 0x4b4   : > { %v653_v36 = vadd.f32 %v1388_v35, %v641_v63 }
 0x4b5   : > { %v1463_v0 = vpop.f32.mrf.mxu0 }
 0x4b7   : > { %v644_v1 = vpop.f32.mrf.mxu0 }
 0x4b9   : > { %v1464_v2 = vpop.f32.mrf.mxu0 }
 0x4ba   : > { %v1641_v2 = vld [vmem:[#allocation8 + $0x18] sm:$0xff]  }
 0x521   : > { %v715_v4 = vpop.xlane.xlu1 %714 }
 0x522   : > { %1650 = vrcp.f32 %v715_v4 }
 0x525   : > { %v886_v13 = vpop.permute.xlu1 %885 }
 0x526   : > { %v891_v20 = vsel %vm551_vm5, %v886_v13, 0 }
 0x52f   : > { %v1651_v5 = vpop.eup %1650 }
 0x530   : > { %v717_v7 = vmul.f32 %v1651_v5, %v1649_v61 }
 0x532   : > { %v718_v9 = vpack.c.bf16 %v717_v7, %v717_v7 }
 0x534   : > { %1474 = vmatmul.mubr.msk.bf16.vlgmr.msra.gmra.mxu0 %vm535_vm4, %v718_v9 }
 0x535   : > { %1484 = vmatpush3.bf16.xpose.msra.mxu0 %v830_v11  ;;  %1485 = vmatprep.mubr.msk.bf16.mxu0 %vm1866_vm1, %v1865_v6 }
 0x536   : > { %1495 = vmatprep.subr.bf16.mxu0 %v1865_v6 }
 0x53c   : > { %1486 = vmatmul.mubr.msk.bf16.vlgmr.msra.gmra.mxu0 %vm487_vm2, %v823_v12 }
 0x53d   : > { %1497 = vmatprep.mubr.msk.bf16.mxu0 %vm1866_vm1, %v1865_v6  ;;  %1496 = vmatpush3.bf16.msra.mxu0 %v1640_v47 }
 0x53e   : > { %1507 = vmatprep.subr.bf16.mxu0 %v1865_v6 }
 0x5f4   : > { %v762_v15 = vpop.f32.mrf.mxu0 }
 0x5f5   : > { %v768_v16 = vpack.c.bf16 %v762_v15, %v762_v15 }
 0x5f6   : > { %v1475_v17 = vpop.f32.mrf.mxu0 }
 0x5f7   : > { %1480 = vmatmul.mubr.msk.bf16.vlgmr.msra.gmra.mxu1 %vm487_vm2, %v768_v16  ;;  %v1642_v17 = vld [vmem:[#allocation9 + $0x8] sm:$0xff]  }
 0x5f8   : > { %1490 = vmatpush3.bf16.msra.mxu1 %v891_v20  ;;  %v765_v21 = vpop.f32.mrf.mxu0  ;;  %1491 = vmatprep.mubr.msk.bf16.mxu1 %vm1866_vm1, %v1865_v6  ;;  %v1643_v20 = vld [vmem:[#allocation9] sm:$0xff]  }
 0x5f9   : > { %1501 = vmatprep.subr.bf16.mxu1 %v1865_v6 }
 0x5fa   : > { %v1476_v22 = vpop.f32.mrf.mxu0 }
 0x5fc   : > { %v866_v23 = vpop.f32.mrf.mxu0 }
 0x5fd   : > { %v872_v24 = vsel %vm482_vm3, %v866_v23, -1e+30 }
 0x5fe   : > { %v1487_v25 = vpop.f32.mrf.mxu0  ;;  %v873_v26 = vsel %vm535_vm4, %v872_v24, -inf }
 0x5ff   : > { %874 = vmax.xlane.f32.xlu0 %v873_v26 }
 0x600   : > { %v869_v27 = vpop.f32.mrf.mxu0 }
 0x602   : > { %v1488_v28 = vpop.f32.mrf.mxu0 }
 0x603   : > { %v1401_v28 = vld [vmem:[%s2238_s5] ss:$0 sm:$0xff] }
 0x688   : > { %v875_v29 = vpop.xlane.xlu0 %874 }
 0x689   : > { %v876_v30 = vsub.f32 %v872_v24, %v875_v29 }
 0x68b   : > { %v877_v31 = vmul.f32 1.442695, %v876_v30 }
 0x68d   : > { %1652 = vpow2.f32 %v877_v31 }
 0x69a   : > { %v1653_v33 = vpop.eup %1652 }
 0x69b   : > { %v879_v34 = vsel %vm535_vm4, %v1653_v33, 0.0 }
 0x69c   : > { %880 = vadd.xlane.f32.xlu1 %v879_v34 }
 0x6ad   : > { %989 = vrot.lane.b32.xlu1 %v2063_v10, %s1869_s4 }
 0x6b1   : > { %987 = vrot.lane.b32.xlu1 %v2069_v14, %s1869_s4 }
 0x6b7   : > { %v815_v37 = vpop.f32.mrf.mxu1 }
 0x6b8   : > { %v821_v38 = vadd.f32 %v815_v37, %v653_v36 }
 0x6b9   : > { %v1481_v39 = vpop.f32.mrf.mxu1 }
 0x6bb   : > { %v818_v40 = vpop.f32.mrf.mxu1 }
 0x6bd   : > { %v1482_v41 = vpop.f32.mrf.mxu1 }
 0x725   : > { %v881_v42 = vpop.xlane.xlu1 %880 }
 0x726   : > { %1654 = vrcp.f32 %v881_v42 }
 0x729   : > { %v990_v45 = vpop.permute.xlu1 %989 }
 0x72a   : > { %v995_v10 = vsel %vm487_vm2, %v990_v45, 0 }
 0x72d   : > { %v988_v14 = vpop.permute.xlu1 %987 }
 0x733   : > { %v1655_v43 = vpop.eup %1654 }
 0x734   : > { %v883_v44 = vmul.f32 %v1655_v43, %v1653_v33 }
 0x736   : > { %v884_v46 = vpack.c.bf16 %v883_v44, %v883_v44 }
 0x738   : > { %1492 = vmatmul.mubr.msk.bf16.vlgmr.msra.gmra.mxu1 %vm535_vm4, %v884_v46 }
 0x739   : > { %1502 = vmatpush3.bf16.xpose.msra.mxu1 %v995_v10  ;;  %1503 = vmatprep.mubr.msk.bf16.mxu1 %vm1866_vm1, %v1865_v6 }
 0x73a   : > { %1513 = vmatprep.subr.bf16.mxu1 %v1865_v6 }
 0x740   : > { %1504 = vmatmul.mubr.msk.bf16.vlgmr.msra.gmra.mxu1 %vm487_vm2, %v988_v14 }
 0x741   : > { %1515 = vmatprep.mubr.msk.bf16.mxu1 %vm1866_vm1, %v1865_v6  ;;  %1514 = vmatpush3.bf16.msra.mxu1 %v1641_v2 }
 0x7f8   : > { %v927_v48 = vpop.f32.mrf.mxu1 }
 0x7f9   : > { %v933_v49 = vpack.c.bf16 %v927_v48, %v927_v48 }
 0x7fa   : > { %v1493_v50 = vpop.f32.mrf.mxu1 }
 0x7fb   : > { %1498 = vmatmul.mubr.msk.bf16.vlgmr.msra.gmra.mxu0 %vm487_vm2, %v933_v49 }
 0x7fc   : > { %v930_v51 = vpop.f32.mrf.mxu1  ;;  %1509 = vmatprep.mubr.msk.bf16.mxu0 %vm1866_vm1, %v1865_v6 }
 0x7fe   : > { %v1494_v52 = vpop.f32.mrf.mxu1 }
 0x800   : > { %v1031_v53 = vpop.f32.mrf.mxu1 }
 0x801   : > { %v1037_v54 = vsel %vm482_vm3, %v1031_v53, -1e+30 }
 0x802   : > { %v1505_v55 = vpop.f32.mrf.mxu1  ;;  %v1038_v56 = vsel %vm535_vm4, %v1037_v54, -inf }
 0x803   : > { %1039 = vmax.xlane.f32.xlu0 %v1038_v56 }
 0x804   : > { %v1034_v57 = vpop.f32.mrf.mxu1 }
 0x806   : > { %v1506_v58 = vpop.f32.mrf.mxu1 }
 0x819   : > { %1050 = vrot.lane.b32.xlu0 %v2094_v32, %s1869_s4 }
 0x88c   : > { %v1040_v59 = vpop.xlane.xlu0 %1039 }
 0x88d   : > { %v1041_v60 = vsub.f32 %v1037_v54, %v1040_v59 }
 0x88f   : > { %v1042_v61 = vmul.f32 1.442695, %v1041_v60 }
 0x890   : > { %v1051_v62 = vpop.permute.xlu0 %1050 }
 0x891   : > { %1656 = vpow2.f32 %v1042_v61  ;;  %v1056_v63 = vsel %vm551_vm5, %v1051_v62, 0 }
 0x892   : > { %1508 = vmatpush3.bf16.msra.mxu0 %v1056_v63 }
 0x893   : > { %1519 = vmatprep.subr.bf16.mxu0 %v1865_v6 }
 0x89e   : > { %v1657_v18 = vpop.eup %1656 }
 0x89f   : > { %v1044_v19 = vsel %vm535_vm4, %v1657_v18, 0.0 }
 0x8a0   : > { %1045 = vadd.xlane.f32.xlu1 %v1044_v19 }
 0x8bb   : > { %v980_v0 = vpop.f32.mrf.mxu0 }
 0x8bc   : > { %v986_v1 = vadd.f32 %v980_v0, %v821_v38 }
 0x8bd   : > { %v1499_v3 = vpop.f32.mrf.mxu0 }
 0x8bf   : > { %v983_v32 = vpop.f32.mrf.mxu0 }
 0x8c1   : > { %v1500_v4 = vpop.f32.mrf.mxu0 }
 0x929   : > { %v1046_v5 = vpop.xlane.xlu1 %1045 }
 0x92a   : > { %1658 = vrcp.f32 %v1046_v5 }
 0x937   : > { %v1659_v7 = vpop.eup %1658 }
 0x938   : > { %v1048_v8 = vmul.f32 %v1659_v7, %v1657_v18 }
 0x93a   : > { %v1049_v9 = vpack.c.bf16 %v1048_v8, %v1048_v8 }
 0x93c   : > { %1510 = vmatmul.mubr.msk.bf16.vlgmr.msra.gmra.mxu0 %vm535_vm4, %v1049_v9 }
 0x93d   : > { %1523 = vmatprep.mubr.msk.bf16.mxu0 %vm1866_vm1, %v1865_v6  ;;  %1520 = vmatpush3.bf16.msra.mxu0 %v1642_v17 }
 0x93e   : > { %1521 = vmatprep.subr.bf16.mxu0 %v1865_v6 }
 0x941   : > { %1522 = vmatpush3.bf16.msra.mxu0 %v1643_v20 }
 0x9fc   : > { %v1092_v11 = vpop.f32.mrf.mxu0 }
 0x9fd   : > { %v1098_v12 = vpack.c.bf16 %v1092_v11, %v1092_v11 }
 0x9fe   : > { %v1511_v13 = vpop.f32.mrf.mxu0 }
 0x9ff   : > { %1516 = vmatmul.mubr.msk.bf16.vlgmr.msra.gmra.mxu1 %vm487_vm2, %v1098_v12 }
 0xa00   : > { %v1095_v15 = vpop.f32.mrf.mxu0 }
 0xa02   : > { %v1512_v16 = vpop.f32.mrf.mxu0 }
 0xabf   : > { %v1145_v21 = vpop.f32.mrf.mxu1 }
 0xac0   : > { %v1151_v22 = vadd.f32 %v1145_v21, %v986_v1 }
 0xac1   : > { %v1517_v23 = vpop.f32.mrf.mxu1 }
 0xac2   : > { %1152 = vst.msk [vmem:[#allocation2] sm:$0xff] %vm392_vm0, %v1151_v22 }
 0xac3   : > { %v1148_v24 = vpop.f32.mrf.mxu1 }
 0xac5   : > { %v1518_v25 = vpop.f32.mrf.mxu1 }
 0xac9   : > { %v1153_v26 = vld [vmem:[#allocation2] sm:$0xff] }
 0xaca   : > { %v1154_v27 = vpack.c.bf16 %v1153_v26, %v1153_v26 }
 0xacc   : > { %1524 = vmatmul.mubr.msk.bf16.vlgmr.msra.gmra.mxu0 %vm392_vm0, %v1154_v27 }
 0xb8c   : > { %v1216_v6 = vpop.f32.mrf.mxu0 }
 0xb8d   : > { %v1217_v29 = vadd.f32 %v1401_v28, %v1216_v6 }
 0xb8e   : > { %v1525_v30 = vpop.f32.mrf.mxu0 }
 0xb8f   : > { %1222 = vst [vmem:[%s342_s30] sm:$0xff] %v1217_v29 }
 0xb90   : > { %v1219_v31 = vpop.f32.mrf.mxu0 }
 0xb91   : > { %1779 = shalt.err (!%p1776_p9)
}
 0xb92   : > { %s1780_s4 = scalar_lea.hbm %s2185_s27, 128  ;;  %s1784_s7 = scalar_lea.hbm %s2239_s6, 256 }
 0xb93   : > { %p1781_p13 = scmp.ne.s32.totalorder %s2185_s27, %s1780_s4  ;;  %p1785_p5 = scmp.lt.s32.totalorder %s2185_s27, %s2239_s6 }
 0xb94   : > { %p1786_p10 = scmp.lt.s32.totalorder %s1784_s7, %s1780_s4 }
 0xb95   : > { %p1782_p12 = pnand %p1781_p13, %p2012_p6 }
 0xb96   : > { %p1787_p11 = por %p1786_p10, %p1785_p5 }
 0xb97   : > { %p1783_p0 = pneg %p1782_p12 }
 0xb99   : > { %p1788_p8 = pnand %p1787_p11, %p1783_p0 }
 0xb9b   : > { %1791 = shalt.err (!%p1788_p8)
}
 0xb9c   : > { %1541 = dma.vmem_to_hbm [thread:$0]  (%p2012_p6), %s2187_s10, 128, %s2185_s27, %s1224_s28   ;;  %v1526_v33 = vpop.f32.mrf.mxu0 }
 0xb9d PF: > { %s1250_s17 = sand.u32 1, %s1834_s21   ;;  %p2260_p3 = scmp.ne.s32.totalorder %s2249_s8, 0 }
 0xb9e   : > { %p2261_p2 = scmp.ge.s32.totalorder %s1854_s26, 2  ;;  %s1251_s18 = scalar_lea.sflag [#allocation5], %s1250_s17 }
 0xba0   : > { %p1558_p1 = pnand %p2261_p2, %p2260_p3 }
 0xba2   : > { %p1559_p4 = pneg %p1558_p1 }
 0xba4   : > { %1829 = dma.done.wait (%p1559_p4), %s1251_s18, 128  }
 0xba5   : > { %1831 = vsyncadd (%p1559_p4), %s1251_s18, 4294967168  ;;  %s24_s26 = sadd.s32 1, %s1854_s26   ;;  %s2262_s21 = smov %s1838_s22 }
 0xba6   : > { %p21_p7 = scmp.ge.s32.totalorder %s24_s26, 4   ;;  %s2263_s22 = smov %s1842_s23 }
 0xba7   : > { %s2264_s23 = smov %s2021_s13  ;;  %s2265_s24 = smov %s1850_s25 }
 0xba8   : > { %s2266_s25 = smov %s2268_s14  ;;  %23 = sbr.rel (!%p21_p7) target bundleno = 12 (0xc), region = 112 }
 0xbad   :  { %1256 = vsyncpa [#allocation4], 1 }
 0xbae   :  { %1258 = vsyncpa [#allocation4 + $0x1], 1 }
 0xbaf   :  { %1259 = vsyncpa [#allocation7], 1 }
 0xbb0   :  { %1260 = vsyncpa [#allocation10], 1 }
 0xbb1   :  { %1261 = vsyncpa [#allocation5], 1 }
 0xbb2   :  { %1263 = vsyncpa [#allocation5 + $0x1], 1 }

// kernel: tpu_custom_call.1
= control target key start
LH: loop header
LB: loop body
LE: loop exit
PB: predicated region body
PF: predicated region fallthrough
CT: control target
= control target key end

     0   :  { %s2233_s0 = inlined_call_operand.hbm [shape: bf16[2,8,32], index: 0, kind: input, shape index: {}]   ;;  %s2234_s1 = inlined_call_operand.hbm [shape: bf16[32,384], index: 1, kind: input, shape index: {}]   ;;  %s2235_s2 = inlined_call_operand.hbm [shape: bf16[4,16,32], index: 2, kind: input, shape index: {}]   ;;  %s2236_s3 = inlined_call_operand.vmem [shape: f32[1,32], index: 3, kind: input, shape index: {}]   ;;  %s2237_s4 = inlined_call_operand.hbm [shape: bf16[32,128], index: 4, kind: input, shape index: {}]   ;;  %s2238_s5 = inlined_call_operand.vmem [shape: f32[1,128], index: 5, kind: input, shape index: {}]   ;;  %s2239_s6 = inlined_call_operand.hbm [shape: f32[2,8,128], index: 6, kind: output, shape index: {}]  }
   0x1   :  { %2243 = sst [smem:[#allocation16_spill]] %s2234_s1 }
   0x2   :  { %2244 = sst [smem:[#allocation17_spill]] %s2235_s2 }
   0x3   :  { %2245 = sst [smem:[#allocation18_spill]] %s2237_s4 }
   0x4   :  { %11 = vsyncpa [#allocation4], 0 }
   0x5   :  { %13 = vsyncpa [#allocation4 + $0x1], 0 }
   0x6   :  { %14 = vsyncpa [#allocation7], 0 }
   0x7   :  { %15 = vsyncpa [#allocation10], 0 }
   0x8   :  { %16 = vsyncpa [#allocation5], 0 }
   0x9   :  { %18 = vsyncpa [#allocation5 + $0x1], 0  ;;  %s1906_s21 = smov 0   ;;  %s1908_s22 = smov 0  }
   0xa   :  { %s1910_s23 = smov 0   ;;  %s1912_s24 = smov 0  }
   0xb   :  { %s1914_s25 = smov 0   ;;  %s1916_s26 = smov 0  }
   0xc LB: > { %s1360_s27 = sadd.s32 4294967295, %s1854_s26   ;;  %s1361_s28 = sadd.s32 4294967294, %s1854_s26   ;;  %s1854_s26 = sphi %s1916_s26, %s24_s26   ;;  %s1850_s25 = sphi %s1914_s25, %s2266_s25   ;;  %s1846_s24 = sphi %s1912_s24, %s2265_s24   ;;  %s1842_s23 = sphi %s1910_s23, %s2264_s23   ;;  %s1838_s22 = sphi %s1908_s22, %s2263_s22   ;;  %s1834_s21 = sphi %s1906_s21, %s2262_s21  }
   0xd   : > { %p56_p0 = scmp.ne.s32.totalorder %s1838_s22, %s1834_s21  ;;  %p1940_p1 = scmp.eq.s32.totalorder %s1360_s27, 0 }
   0xe   : > { %p1944_p2 = scmp.eq.s32.totalorder %s1360_s27, 1  ;;  %p203_p3 = scmp.eq.s32.totalorder %s1361_s28, 1 }
   0xf   : > { %s2246_s29 = scalar_select %p1940_p1, 1, 0 }
  0x10   : > { %p1950_p4 = por %p1940_p1, %p56_p0  ;;  %p1362_p5 = scmp.ge.s32.totalorder %s1854_s26, 1 }
  0x11   : > { %p1955_p6 = por %p203_p3, %p56_p0  ;;  %p210_p7 = scmp.lt.s32.totalorder %s1854_s26, 3 }
  0x12   : > { %s2248_s7 = scalar_select %p1950_p4, 1, 0 }
  0x13   : > { %s2249_s8 = scalar_select %p1955_p6, 1, 0 }
  0x14   : > { %p1960_p8 = pnand %p1362_p5, %p210_p7  ;;  %s1856_s10 = smov [#allocation6]  }
  0x15   : > { %s222_s11 = sshll.u32 %s1856_s10, 4  ;;  %s1857_s13 = smov [#allocation8]   ;;  %s223_s11 = int_to_ptr.vmem [resolvable:$true] %s222_s11 }
  0x16   : > { %p1543_p9 = pneg %p1960_p8  ;;  %s235_s14 = sshll.u32 %s1857_s13, 4  ;;  %s236_s14 = int_to_ptr.vmem [resolvable:$true] %s235_s14 }
  0x17   : > { %s1671_s15 = scalar_lea.vmem %s223_s11, 768  ;;  %p1679_p5 = scmp.lt.s32.totalorder %s223_s11, %s223_s11 }
  0x18   : > { %p1969_p11 = pnand %p1543_p9, %p1940_p1  ;;  %p1672_p13 = scmp.ne.s32.totalorder %s223_s11, %s1671_s15 }
  0x19   : > { %p1680_p7 = scmp.lt.s32.totalorder %s1671_s15, %s1671_s15 }
  0x1a   : > { %p1662_p12 = pneg %p1969_p11 }
  0x1b   : > { %p1681_p10 = por %p1680_p7, %p1679_p5 }
  0x1c   : > { %p1674_p0 = pnand %p1672_p13, %p1662_p12 }
  0x1e   : > { %p1675_p3 = pneg %p1674_p0 }
  0x20   : > { %p1682_p9 = pnand %p1681_p10, %p1675_p3 }
  0x22   : > { %1685 = shalt.err (!%p1682_p9)
}
  0x23   : > { %s1858_s16 = smov 192   ;;  %s1859_s17 = smov 12  }
  0x24   : > { %s2252_s1 = sld [smem:[#allocation16_spill]]  ;;  %s1697_s20 = scalar_lea.vmem %s236_s14, 512 }
  0x25   : > { %p1698_p6 = scmp.ne.s32.totalorder %s236_s14, %s1697_s20  ;;  %p1705_p1 = scmp.lt.s32.totalorder %s236_s14, %s236_s14 }
  0x26   : > { %p1706_p4 = scmp.lt.s32.totalorder %s1697_s20, %s1697_s20 }
  0x27   : > { %p1700_p13 = pnand %p1698_p6, %p1662_p12 }
  0x28   : > { %p1707_p5 = por %p1706_p4, %p1705_p1 }
  0x29   : > { %p1701_p0 = pneg %p1700_p13 }
  0x2a   : > { %1546 = dma.hbm_to_vmem [thread:$0]  (!%p1969_p11), %s2252_s1, 768, %s223_s11, [#allocation7], %s1858_s16, %s1858_s16, %s1859_s17  }
  0x2b   : > { %p1708_p10 = pnand %p1707_p5, %p1701_p0 }
  0x2d   : > { %1711 = shalt.err (!%p1708_p10)
}
  0x2e   : > { %s1860_s27 = smov 64   ;;  %s1861_s28 = smov 4  }
  0x2f   : > { %s2253_s2 = sld [smem:[#allocation17_spill]]  ;;  %s1862_s11 = smov [#allocation9]  }
  0x30   : > { %s253_s15 = sshll.u32 %s1862_s11, 4  ;;  %s254_s15 = int_to_ptr.vmem [resolvable:$true] %s253_s15 }
  0x31   : > { %s1723_s16 = scalar_lea.vmem %s254_s15, 256  ;;  %p1731_p4 = scmp.lt.s32.totalorder %s254_s15, %s254_s15 }
  0x32   : > { %p1724_p6 = scmp.ne.s32.totalorder %s254_s15, %s1723_s16  ;;  %p1732_p7 = scmp.lt.s32.totalorder %s1723_s16, %s1723_s16 }
  0x34   : > { %p1726_p3 = pnand %p1724_p6, %p1662_p12  ;;  %p1733_p9 = por %p1732_p7, %p1731_p4 }
  0x35   : > { %1549 = dma.hbm_to_vmem [thread:$0]  (!%p1969_p11), %s2253_s2, 512, %s236_s14, [#allocation7], %s1860_s27, %s1860_s27, %s1861_s28  }
  0x36   : > { %p1727_p1 = pneg %p1726_p3 }
  0x38   : > { %p1734_p13 = pnand %p1733_p9, %p1727_p1 }
  0x3a   : > { %1737 = shalt.err (!%p1734_p13)
}
  0x3b   : > { %s2254_s4 = sld [smem:[#allocation18_spill]]  ;;  %s36_s14 = sadd.s32 1, %s1850_s25 }
  0x3c   : > { %p38_p12 = scmp.ge.s32.totalorder %s36_s14, 2  ;;  %s43_s19 = sadd.s32 1, %s1842_s23 }
  0x3d   : > { %p50_p0 = scmp.ne.s32.totalorder %s1842_s23, %s1838_s22  ;;  %p51_p5 = scmp.eq.s32.totalorder %s1854_s26, 0 }
  0x3e   : > { %s2268_s14 = smov (%p38_p12, %s36_s14), 0  ;;  %s1369_s11 = sshll.u32 %s1850_s25, 6 }
  0x3f   : > { %p2006_p10 = por %p51_p5, %p50_p0  ;;  %p2012_p6 = por %p1944_p2, %p50_p0 }
  0x40   : > { %s40_s10 = ssub.s32 %s1850_s25, %s2268_s14  ;;  %s282_s17 = scalar_lea.hbm %s2233_s0, %s1369_s11 }
  0x41   : > { %1552 = dma.hbm_to_vmem [thread:$0]  (!%p1969_p11), %s2254_s4, 256, %s254_s15, [#allocation10], %s1860_s27, %s1860_s27, %s1861_s28  }
  0x42   : > { %p1564_p11 = scmp.lt.s32.totalorder %s1854_s26, 2  ;;  %p41_p3 = scmp.eq.s32.totalorder %s40_s10, 0 }
  0x43   : > { %s273_s27 = sand.u32 1, %s1842_s23  }
  0x44   : > { %s1368_s28 = sshll.u32 %s273_s27, 2  ;;  %p2029_p2 = pnand %p1564_p11, %p2006_p10 }
  0x45   : > { %s2021_s13 = scalar_select %p41_p3, %s1842_s23, %s43_s19  }
  0x46   : > { %s277_s18 = scalar_lea.vmem [#allocation3], %s1368_s28  ;;  %s274_s2 = scalar_lea.sflag [#allocation4], %s273_s27 }
  0x47   : > { %s284_s1 = sshll.u32 %s277_s18, 4  ;;  %p1740_p1 = pneg %p2029_p2  ;;  %s285_s1 = int_to_ptr.vmem [resolvable:$true] %s284_s1 }
  0x48   : > { %s1751_s10 = scalar_lea.vmem %s285_s1, 64  ;;  %s1863_s19 = smov [#allocation3]  }
  0x49   : > { %p1752_p4 = scmp.ne.s32.totalorder %s285_s1, %s1751_s10  ;;  %s1756_s4 = sshll.u32 %s1863_s19, 4  ;;  %s1757_s4 = int_to_ptr.vmem [resolvable:$false] %s1756_s4 }
  0x4a   : > { %s1758_s11 = scalar_lea.vmem %s1757_s4, 128  ;;  %p1759_p13 = scmp.lt.s32.totalorder %s285_s1, %s1757_s4 }
  0x4b   : > { %p1754_p7 = pnand %p1752_p4, %p1740_p1  ;;  %p1760_p12 = scmp.lt.s32.totalorder %s1758_s11, %s1751_s10 }
  0x4d   : > { %p1755_p9 = pneg %p1754_p7  ;;  %p1761_p0 = por %p1760_p12, %p1759_p13 }
  0x4f   : > { %p1762_p5 = pnand %p1761_p0, %p1755_p9 }
  0x51   : > { %1765 = shalt.err (!%p1762_p5)
}
  0x52   : > { %1556 = dma.hbm_to_vmem [thread:$0]  (!%p2029_p2), %s282_s17, 64, %s285_s1, %s274_s2  }
  0x53   : > { %293 = sbr.rel (%p1960_p8) target bundleno = 2973 (0xb9d), region = 44  ;;  %s2040_s12 = sand.u32 (!%p1960_p8), 1, %s1838_s22  }
  0x54   : > { %s1371_s27 = sshll.u32 (!%p1960_p8), %s2040_s12, 2  ;;  %s296_s28 = scalar_lea.sflag (!%p1960_p8), [#allocation4], %s2040_s12 }
  0x55   : > { %s299_s15 = scalar_lea.vmem (!%p1960_p8), [#allocation3], %s1371_s27  ;;  %p2258_p10 = scmp.ne.s32.totalorder (!%p1960_p8), %s2248_s7, 0 }
  0x58   : > { %1817 = dma.done.wait (%p2258_p10), %s296_s28, 64  }
  0x59   : > { %1819 = vsyncadd (%p2258_p10), %s296_s28, 4294967232  ;;  %p2259_p11 = scmp.ne.s32.totalorder %s2246_s29, 0 }
  0x5b   : > { %1821 = dma.done.wait (%p2259_p11), [#allocation7], 1280  }
  0x5c   : > { %1823 = vsyncadd (%p2259_p11), [#allocation7], 4294966016 }
  0x5d   : > { %1825 = dma.done.wait (%p2259_p11), [#allocation10], 256  }
  0x5e   : > { %1827 = vsyncadd (%p2259_p11), [#allocation10], 4294967040  ;;  %v1864_v0 = vmov 0   ;;  %v1630_v1 = vld [vmem:[#allocation6 + $0x1c] ss:$12 sps:$4 sm:$0xff]   ;;  %vm392_vm0 = vcmask 261120   ;;  %v478_v17 = vlaneseq }
  0x5f   : > { %428 = vmatprep.mubr.bf16.mxu0 %v1864_v0  ;;  %v1632_v2 = vld [vmem:[#allocation6 + $0x18] ss:$12 sps:$4 sm:$0xff]   ;;  %408 = vmatprep.subr.bf16.mxu0 %v1630_v1  ;;  %v1635_v4 = vld [vmem:[#allocation6] ss:$12 sps:$4 sm:$0xff]   ;;  %v1865_v6 = vmov 0.0   ;;  %vm1866_vm1 = vmmov 0  }
  0x60   : > { %v1633_v3 = vld [vmem:[#allocation6 + $0x4] ss:$12 sps:$4 sm:$0xff]   ;;  %409 = vmatpush1.bf16.msra.mxu0 %v1632_v2  ;;  %v351_v5 = vld [vmem:[%s299_s15] sm:$0xf]  ;;  %1439 = vmatprep.subr.bf16.mxu1 %v1865_v6  ;;  %vm487_vm2 = vcmask 130048   ;;  %s1867_s1 = smov 112  }
  0x61   : > { %410 = vmatprep.subr.bf16.mxu0 %v1633_v3  ;;  %1443 = vmatprep.mubr.msk.bf16.mxu1 %vm1866_vm1, %v1865_v6  ;;  %v1636_v15 = vld [vmem:[#allocation6 + $0x20] ss:$12 sps:$4 sm:$0xff]   ;;  %v1637_v16 = vld [vmem:[#allocation6 + $0x8] ss:$12 sps:$4 sm:$0xff]   ;;  %v2083_v18 = vshrl.u32 %v478_v17, 7  ;;  %v2085_v19 = vand.u32 127, %v478_v17 }
  0x62   : > { %1440 = vmatpush3.bf16.msra.mxu1 %v1636_v15  ;;  %vm535_vm4 = vcmask 64512   ;;  %vm551_vm5 = vcmask 1043456   ;;  %v1638_v44 = vld [vmem:[#allocation8] sm:$0xff]   ;;  %s1868_s2 = smov 96   ;;  %v1639_v3 = vld [vmem:[#allocation8 + $0x8] sm:$0xff]   ;;  %s1869_s4 = smov 80  }
  0x63   : > { %1441 = vmatprep.subr.bf16.mxu1 %v1865_v6  ;;  %vm482_vm3 = vcmp.le.s32.totalorder %v2085_v19, %v2083_v18  ;;  %s1375_s9 = sshll.u32 %s2040_s12, 3  ;;  %s1406_s18 = sshll.u32 %s1846_s24, 7 }
  0x64   : > { %411 = vmatpush1.bf16.msra.mxu0 %v1635_v4  ;;  %s342_s30 = scalar_lea.vmem [#allocation11], %s1375_s9  ;;  %s2185_s27 = scalar_lea.hbm %s2239_s6, %s1406_s18 }
  0x65   : > { %1447 = vmatprep.subr.bf16.mxu0 %v1865_v6  ;;  %s1238_s10 = sshll.u32 %s342_s30, 4  ;;  %s1224_s28 = scalar_lea.sflag [#allocation5], %s2040_s12  ;;  %s2187_s10 = int_to_ptr.vmem [resolvable:$true] %s1238_s10 }
  0x66   : > { %1442 = vmatpush3.bf16.msra.mxu1 %v1637_v16  ;;  %s1766_s15 = scalar_lea.vmem %s2187_s10, 128  ;;  %s1870_s24 = smov [#allocation11]  }
  0x67   : > { %1382 = vmatmul.mubr.msk.bf16.vlgmr.msra.gmra.mxu0 %vm392_vm0, %v351_v5  ;;  %1453 = vmatprep.subr.bf16.mxu1 %v1865_v6  ;;  %p1767_p8 = scmp.ne.s32.totalorder %s2187_s10, %s1766_s15 }
  0x68   : > { %1449 = vmatprep.mubr.msk.bf16.mxu0 %vm1866_vm1, %v1865_v6 }
  0x69   : > { %1444 = vmatmul.mubr.msk.bf16.vlgmr.msra.gmra.mxu1 %vm392_vm0, %v351_v5  ;;  %p1768_p3 = pnand %p1767_p8, %p2012_p6 }
  0x6a   : > { %1455 = vmatprep.mubr.msk.bf16.mxu1 %vm1866_vm1, %v1865_v6 }
  0x6b   : > { %p1769_p2 = pneg %p1768_p3 }
 0x127   : > { %v430_v7 = vpop.f32.mrf.mxu0 }
 0x128   : > { %v477_v9 = vmul.f32 0.25, %v430_v7 }
 0x129   : > { %v432_v8 = vpop.f32.mrf.mxu0  ;;  %v471_v31 = vpop.f32.mrf.mxu1 }
 0x12a   : > { %v2063_v10 = vpack.c.bf16 %v432_v8, %v432_v8  ;;  %v2069_v14 = vpack.c.bf16 %v477_v9, %v477_v9  ;;  %v2094_v32 = vpack.c.bf16 %v471_v31, %v471_v31 }
 0x12b   : > { %v434_v11 = vpop.f32.mrf.mxu0  ;;  %v1445_v33 = vpop.f32.mrf.mxu1 }
 0x12c   : > { %658 = vrot.lane.b32.xlu1 %v2063_v10, %s1867_s1  ;;  %v492_v12 = vsel %vm487_vm2, %v2063_v10, 0  ;;  %v553_v34 = vsel %vm551_vm5, %v2094_v32, 0 }
 0x12d   : > { %v435_v13 = vpop.f32.mrf.mxu0  ;;  %1448 = vmatpush3.bf16.xpose.msra.mxu0 %v492_v12  ;;  %v474_v35 = vpop.f32.mrf.mxu1  ;;  %1454 = vmatpush3.bf16.msra.mxu1 %v553_v34 }
 0x12e   : > { %1459 = vmatprep.subr.bf16.mxu0 %v1865_v6  ;;  %1465 = vmatprep.subr.bf16.mxu1 %v1865_v6  ;;  %v1388_v35 = vld [vmem:[%s2236_s3] ss:$0 sm:$0xff] }
 0x12f   : > { %v1446_v36 = vpop.f32.mrf.mxu1 }
 0x130   : > { %655 = vrot.lane.b32.xlu1 %v2069_v14, %s1867_s1 }
 0x134   : > { %1450 = vmatmul.mubr.msk.bf16.vlgmr.msra.gmra.mxu0 %vm487_vm2, %v2069_v14 }
 0x135   : > { %1461 = vmatprep.mubr.msk.bf16.mxu0 %vm1866_vm1, %v1865_v6  ;;  %1460 = vmatpush3.bf16.msra.mxu0 %v1638_v44 }
 0x136   : > { %1471 = vmatprep.subr.bf16.mxu0 %v1865_v6 }
 0x19e   : > { %v659_v40 = vpop.permute.xlu1 %658 }
 0x19f   : > { %v664_v42 = vsel %vm487_vm2, %v659_v40, 0 }
 0x1a2   : > { %v656_v43 = vpop.permute.xlu1 %655 }
 0x1f4   : > { %v528_v20 = vpop.f32.mrf.mxu0 }
 0x1f5   : > { %v534_v21 = vsel %vm482_vm3, %v528_v20, -1e+30 }
 0x1f6   : > { %v1451_v22 = vpop.f32.mrf.mxu0  ;;  %v536_v23 = vsel %vm535_vm4, %v534_v21, -inf }
 0x1f7   : > { %537 = vmax.xlane.f32.xlu0 %v536_v23 }
 0x1f8   : > { %v531_v24 = vpop.f32.mrf.mxu0 }
 0x1fa   : > { %v1452_v25 = vpop.f32.mrf.mxu0 }
 0x280   : > { %v538_v26 = vpop.xlane.xlu0 %537 }
 0x281   : > { %v539_v27 = vsub.f32 %v534_v21, %v538_v26 }
 0x283   : > { %v540_v28 = vmul.f32 1.442695, %v539_v27 }
 0x285   : > { %1644 = vpow2.f32 %v540_v28 }
 0x292   : > { %v1645_v29 = vpop.eup %1644 }
 0x293   : > { %v542_v30 = vsel %vm535_vm4, %v1645_v29, 0.0 }
 0x294   : > { %543 = vadd.xlane.f32.xlu0 %v542_v30 }
 0x31d   : > { %v544_v37 = vpop.xlane.xlu0 %543 }
 0x31e   : > { %1646 = vrcp.f32 %v544_v37 }
 0x32b   : > { %v1647_v38 = vpop.eup %1646 }
 0x32c   : > { %v546_v39 = vmul.f32 %v1647_v38, %v1645_v29 }
 0x32e   : > { %v547_v41 = vpack.c.bf16 %v546_v39, %v546_v39 }
 0x330   : > { %1456 = vmatmul.mubr.msk.bf16.vlgmr.msra.gmra.mxu1 %vm535_vm4, %v547_v41 }
 0x331   : > { %1466 = vmatpush3.bf16.xpose.msra.mxu1 %v664_v42  ;;  %1467 = vmatprep.mubr.msk.bf16.mxu1 %vm1866_vm1, %v1865_v6 }
 0x332   : > { %1477 = vmatprep.subr.bf16.mxu1 %v1865_v6 }
 0x338   : > { %1468 = vmatmul.mubr.msk.bf16.vlgmr.msra.gmra.mxu1 %vm487_vm2, %v656_v43 }
 0x339   : > { %1479 = vmatprep.mubr.msk.bf16.mxu1 %vm1866_vm1, %v1865_v6  ;;  %1478 = vmatpush3.bf16.msra.mxu1 %v1639_v3 }
 0x33a   : > { %1489 = vmatprep.subr.bf16.mxu1 %v1865_v6 }
 0x3f0   : > { %v589_v45 = vpop.f32.mrf.mxu1 }
 0x3f1   : > { %v595_v46 = vpack.c.bf16 %v589_v45, %v589_v45 }
 0x3f2   : > { %v1457_v47 = vpop.f32.mrf.mxu1 }
 0x3f3   : > { %1462 = vmatmul.mubr.msk.bf16.vlgmr.msra.gmra.mxu0 %vm487_vm2, %v595_v46  ;;  %v1640_v47 = vld [vmem:[#allocation8 + $0x10] sm:$0xff]  }
 0x3f4   : > { %v592_v48 = vpop.f32.mrf.mxu1  ;;  %1473 = vmatprep.mubr.msk.bf16.mxu0 %vm1866_vm1, %v1865_v6 }
 0x3f6   : > { %v1458_v49 = vpop.f32.mrf.mxu1 }
 0x3f8   : > { %v700_v50 = vpop.f32.mrf.mxu1 }
 0x3f9   : > { %v706_v51 = vsel %vm482_vm3, %v700_v50, -1e+30 }
 0x3fa   : > { %v1469_v52 = vpop.f32.mrf.mxu1  ;;  %v707_v53 = vsel %vm535_vm4, %v706_v51, -inf }
 0x3fb   : > { %708 = vmax.xlane.f32.xlu0 %v707_v53 }
 0x3fc   : > { %v703_v54 = vpop.f32.mrf.mxu1 }
 0x3fe   : > { %v1470_v55 = vpop.f32.mrf.mxu1 }
 0x411   : > { %720 = vrot.lane.b32.xlu0 %v2094_v32, %s1867_s1  ;;  %s1770_s1 = sshll.u32 %s1870_s24, 4  ;;  %s1771_s1 = int_to_ptr.vmem [resolvable:$false] %s1770_s1 }
 0x412   : > { %p1773_p1 = scmp.lt.s32.totalorder %s2187_s10, %s1771_s1 }
 0x415   : > { %824 = vrot.lane.b32.xlu0 %v2063_v10, %s1868_s2 }
 0x419   : > { %822 = vrot.lane.b32.xlu0 %v2069_v14, %s1868_s2 }
 0x484   : > { %v709_v56 = vpop.xlane.xlu0 %708 }
 0x485   : > { %v710_v57 = vsub.f32 %v706_v51, %v709_v56 }
 0x487   : > { %v711_v58 = vmul.f32 1.442695, %v710_v57 }
 0x488   : > { %v721_v59 = vpop.permute.xlu0 %720 }
 0x489   : > { %1648 = vpow2.f32 %v711_v58  ;;  %v726_v60 = vsel %vm551_vm5, %v721_v59, 0 }
 0x48a   : > { %1472 = vmatpush3.bf16.msra.mxu0 %v726_v60 }
 0x48b   : > { %1483 = vmatprep.subr.bf16.mxu0 %v1865_v6 }
 0x48c   : > { %v825_v8 = vpop.permute.xlu0 %824 }
 0x48d   : > { %v830_v11 = vsel %vm487_vm2, %v825_v8, 0 }
 0x490   : > { %v823_v12 = vpop.permute.xlu0 %822 }
 0x496   : > { %v1649_v61 = vpop.eup %1648 }
 0x497   : > { %v713_v62 = vsel %vm535_vm4, %v1649_v61, 0.0 }
 0x498   : > { %714 = vadd.xlane.f32.xlu1 %v713_v62 }
 0x4a9   : > { %885 = vrot.lane.b32.xlu1 %v2094_v32, %s1868_s2  ;;  %s1772_s2 = scalar_lea.vmem %s1771_s1, 256 }
 0x4aa   : > { %p1774_p4 = scmp.lt.s32.totalorder %s1772_s2, %s1766_s15 }
 0x4ac   : > { %p1775_p7 = por %p1774_p4, %p1773_p1 }
 0x4ae   : > { %p1776_p9 = pnand %p1775_p7, %p1769_p2 }
 0x4b3   : > { %v641_v63 = vpop.f32.mrf.mxu0 }
 0x4b4   : > { %v653_v36 = vadd.f32 %v1388_v35, %v641_v63 }
 0x4b5   : > { %v1463_v0 = vpop.f32.mrf.mxu0 }
 0x4b7   : > { %v644_v1 = vpop.f32.mrf.mxu0 }
 0x4b9   : > { %v1464_v2 = vpop.f32.mrf.mxu0 }
 0x4ba   : > { %v1641_v2 = vld [vmem:[#allocation8 + $0x18] sm:$0xff]  }
 0x521   : > { %v715_v4 = vpop.xlane.xlu1 %714 }
 0x522   : > { %1650 = vrcp.f32 %v715_v4 }
 0x525   : > { %v886_v13 = vpop.permute.xlu1 %885 }
 0x526   : > { %v891_v20 = vsel %vm551_vm5, %v886_v13, 0 }
 0x52f   : > { %v1651_v5 = vpop.eup %1650 }
 0x530   : > { %v717_v7 = vmul.f32 %v1651_v5, %v1649_v61 }
 0x532   : > { %v718_v9 = vpack.c.bf16 %v717_v7, %v717_v7 }
 0x534   : > { %1474 = vmatmul.mubr.msk.bf16.vlgmr.msra.gmra.mxu0 %vm535_vm4, %v718_v9 }
 0x535   : > { %1484 = vmatpush3.bf16.xpose.msra.mxu0 %v830_v11  ;;  %1485 = vmatprep.mubr.msk.bf16.mxu0 %vm1866_vm1, %v1865_v6 }
 0x536   : > { %1495 = vmatprep.subr.bf16.mxu0 %v1865_v6 }
 0x53c   : > { %1486 = vmatmul.mubr.msk.bf16.vlgmr.msra.gmra.mxu0 %vm487_vm2, %v823_v12 }
 0x53d   : > { %1497 = vmatprep.mubr.msk.bf16.mxu0 %vm1866_vm1, %v1865_v6  ;;  %1496 = vmatpush3.bf16.msra.mxu0 %v1640_v47 }
 0x53e   : > { %1507 = vmatprep.subr.bf16.mxu0 %v1865_v6 }
 0x5f4   : > { %v762_v15 = vpop.f32.mrf.mxu0 }
 0x5f5   : > { %v768_v16 = vpack.c.bf16 %v762_v15, %v762_v15 }
 0x5f6   : > { %v1475_v17 = vpop.f32.mrf.mxu0 }
 0x5f7   : > { %1480 = vmatmul.mubr.msk.bf16.vlgmr.msra.gmra.mxu1 %vm487_vm2, %v768_v16  ;;  %v1642_v17 = vld [vmem:[#allocation9 + $0x8] sm:$0xff]  }
 0x5f8   : > { %1490 = vmatpush3.bf16.msra.mxu1 %v891_v20  ;;  %v765_v21 = vpop.f32.mrf.mxu0  ;;  %1491 = vmatprep.mubr.msk.bf16.mxu1 %vm1866_vm1, %v1865_v6  ;;  %v1643_v20 = vld [vmem:[#allocation9] sm:$0xff]  }
 0x5f9   : > { %1501 = vmatprep.subr.bf16.mxu1 %v1865_v6 }
 0x5fa   : > { %v1476_v22 = vpop.f32.mrf.mxu0 }
 0x5fc   : > { %v866_v23 = vpop.f32.mrf.mxu0 }
 0x5fd   : > { %v872_v24 = vsel %vm482_vm3, %v866_v23, -1e+30 }
 0x5fe   : > { %v1487_v25 = vpop.f32.mrf.mxu0  ;;  %v873_v26 = vsel %vm535_vm4, %v872_v24, -inf }
 0x5ff   : > { %874 = vmax.xlane.f32.xlu0 %v873_v26 }
 0x600   : > { %v869_v27 = vpop.f32.mrf.mxu0 }
 0x602   : > { %v1488_v28 = vpop.f32.mrf.mxu0 }
 0x603   : > { %v1401_v28 = vld [vmem:[%s2238_s5] ss:$0 sm:$0xff] }
 0x688   : > { %v875_v29 = vpop.xlane.xlu0 %874 }
 0x689   : > { %v876_v30 = vsub.f32 %v872_v24, %v875_v29 }
 0x68b   : > { %v877_v31 = vmul.f32 1.442695, %v876_v30 }
 0x68d   : > { %1652 = vpow2.f32 %v877_v31 }
 0x69a   : > { %v1653_v33 = vpop.eup %1652 }
 0x69b   : > { %v879_v34 = vsel %vm535_vm4, %v1653_v33, 0.0 }
 0x69c   : > { %880 = vadd.xlane.f32.xlu1 %v879_v34 }
 0x6ad   : > { %989 = vrot.lane.b32.xlu1 %v2063_v10, %s1869_s4 }
 0x6b1   : > { %987 = vrot.lane.b32.xlu1 %v2069_v14, %s1869_s4 }
 0x6b7   : > { %v815_v37 = vpop.f32.mrf.mxu1 }
 0x6b8   : > { %v821_v38 = vadd.f32 %v815_v37, %v653_v36 }
 0x6b9   : > { %v1481_v39 = vpop.f32.mrf.mxu1 }
 0x6bb   : > { %v818_v40 = vpop.f32.mrf.mxu1 }
 0x6bd   : > { %v1482_v41 = vpop.f32.mrf.mxu1 }
 0x725   : > { %v881_v42 = vpop.xlane.xlu1 %880 }
 0x726   : > { %1654 = vrcp.f32 %v881_v42 }
 0x729   : > { %v990_v45 = vpop.permute.xlu1 %989 }
 0x72a   : > { %v995_v10 = vsel %vm487_vm2, %v990_v45, 0 }
 0x72d   : > { %v988_v14 = vpop.permute.xlu1 %987 }
 0x733   : > { %v1655_v43 = vpop.eup %1654 }
 0x734   : > { %v883_v44 = vmul.f32 %v1655_v43, %v1653_v33 }
 0x736   : > { %v884_v46 = vpack.c.bf16 %v883_v44, %v883_v44 }
 0x738   : > { %1492 = vmatmul.mubr.msk.bf16.vlgmr.msra.gmra.mxu1 %vm535_vm4, %v884_v46 }
 0x739   : > { %1502 = vmatpush3.bf16.xpose.msra.mxu1 %v995_v10  ;;  %1503 = vmatprep.mubr.msk.bf16.mxu1 %vm1866_vm1, %v1865_v6 }
 0x73a   : > { %1513 = vmatprep.subr.bf16.mxu1 %v1865_v6 }
 0x740   : > { %1504 = vmatmul.mubr.msk.bf16.vlgmr.msra.gmra.mxu1 %vm487_vm2, %v988_v14 }
 0x741   : > { %1515 = vmatprep.mubr.msk.bf16.mxu1 %vm1866_vm1, %v1865_v6  ;;  %1514 = vmatpush3.bf16.msra.mxu1 %v1641_v2 }
 0x7f8   : > { %v927_v48 = vpop.f32.mrf.mxu1 }
 0x7f9   : > { %v933_v49 = vpack.c.bf16 %v927_v48, %v927_v48 }
 0x7fa   : > { %v1493_v50 = vpop.f32.mrf.mxu1 }
 0x7fb   : > { %1498 = vmatmul.mubr.msk.bf16.vlgmr.msra.gmra.mxu0 %vm487_vm2, %v933_v49 }
 0x7fc   : > { %v930_v51 = vpop.f32.mrf.mxu1  ;;  %1509 = vmatprep.mubr.msk.bf16.mxu0 %vm1866_vm1, %v1865_v6 }
 0x7fe   : > { %v1494_v52 = vpop.f32.mrf.mxu1 }
 0x800   : > { %v1031_v53 = vpop.f32.mrf.mxu1 }
 0x801   : > { %v1037_v54 = vsel %vm482_vm3, %v1031_v53, -1e+30 }
 0x802   : > { %v1505_v55 = vpop.f32.mrf.mxu1  ;;  %v1038_v56 = vsel %vm535_vm4, %v1037_v54, -inf }
 0x803   : > { %1039 = vmax.xlane.f32.xlu0 %v1038_v56 }
 0x804   : > { %v1034_v57 = vpop.f32.mrf.mxu1 }
 0x806   : > { %v1506_v58 = vpop.f32.mrf.mxu1 }
 0x819   : > { %1050 = vrot.lane.b32.xlu0 %v2094_v32, %s1869_s4 }
 0x88c   : > { %v1040_v59 = vpop.xlane.xlu0 %1039 }
 0x88d   : > { %v1041_v60 = vsub.f32 %v1037_v54, %v1040_v59 }
 0x88f   : > { %v1042_v61 = vmul.f32 1.442695, %v1041_v60 }
 0x890   : > { %v1051_v62 = vpop.permute.xlu0 %1050 }
 0x891   : > { %1656 = vpow2.f32 %v1042_v61  ;;  %v1056_v63 = vsel %vm551_vm5, %v1051_v62, 0 }
 0x892   : > { %1508 = vmatpush3.bf16.msra.mxu0 %v1056_v63 }
 0x893   : > { %1519 = vmatprep.subr.bf16.mxu0 %v1865_v6 }
 0x89e   : > { %v1657_v18 = vpop.eup %1656 }
 0x89f   : > { %v1044_v19 = vsel %vm535_vm4, %v1657_v18, 0.0 }
 0x8a0   : > { %1045 = vadd.xlane.f32.xlu1 %v1044_v19 }
 0x8bb   : > { %v980_v0 = vpop.f32.mrf.mxu0 }
 0x8bc   : > { %v986_v1 = vadd.f32 %v980_v0, %v821_v38 }
 0x8bd   : > { %v1499_v3 = vpop.f32.mrf.mxu0 }
 0x8bf   : > { %v983_v32 = vpop.f32.mrf.mxu0 }
 0x8c1   : > { %v1500_v4 = vpop.f32.mrf.mxu0 }
 0x929   : > { %v1046_v5 = vpop.xlane.xlu1 %1045 }
 0x92a   : > { %1658 = vrcp.f32 %v1046_v5 }
 0x937   : > { %v1659_v7 = vpop.eup %1658 }
 0x938   : > { %v1048_v8 = vmul.f32 %v1659_v7, %v1657_v18 }
 0x93a   : > { %v1049_v9 = vpack.c.bf16 %v1048_v8, %v1048_v8 }
 0x93c   : > { %1510 = vmatmul.mubr.msk.bf16.vlgmr.msra.gmra.mxu0 %vm535_vm4, %v1049_v9 }
 0x93d   : > { %1523 = vmatprep.mubr.msk.bf16.mxu0 %vm1866_vm1, %v1865_v6  ;;  %1520 = vmatpush3.bf16.msra.mxu0 %v1642_v17 }
 0x93e   : > { %1521 = vmatprep.subr.bf16.mxu0 %v1865_v6 }
 0x941   : > { %1522 = vmatpush3.bf16.msra.mxu0 %v1643_v20 }
 0x9fc   : > { %v1092_v11 = vpop.f32.mrf.mxu0 }
 0x9fd   : > { %v1098_v12 = vpack.c.bf16 %v1092_v11, %v1092_v11 }
 0x9fe   : > { %v1511_v13 = vpop.f32.mrf.mxu0 }
 0x9ff   : > { %1516 = vmatmul.mubr.msk.bf16.vlgmr.msra.gmra.mxu1 %vm487_vm2, %v1098_v12 }
 0xa00   : > { %v1095_v15 = vpop.f32.mrf.mxu0 }
 0xa02   : > { %v1512_v16 = vpop.f32.mrf.mxu0 }
 0xabf   : > { %v1145_v21 = vpop.f32.mrf.mxu1 }
 0xac0   : > { %v1151_v22 = vadd.f32 %v1145_v21, %v986_v1 }
 0xac1   : > { %v1517_v23 = vpop.f32.mrf.mxu1 }
 0xac2   : > { %1152 = vst.msk [vmem:[#allocation2] sm:$0xff] %vm392_vm0, %v1151_v22 }
 0xac3   : > { %v1148_v24 = vpop.f32.mrf.mxu1 }
 0xac5   : > { %v1518_v25 = vpop.f32.mrf.mxu1 }
 0xac9   : > { %v1153_v26 = vld [vmem:[#allocation2] sm:$0xff] }
 0xaca   : > { %v1154_v27 = vpack.c.bf16 %v1153_v26, %v1153_v26 }
 0xacc   : > { %1524 = vmatmul.mubr.msk.bf16.vlgmr.msra.gmra.mxu0 %vm392_vm0, %v1154_v27 }
 0xb8c   : > { %v1216_v6 = vpop.f32.mrf.mxu0 }
 0xb8d   : > { %v1217_v29 = vadd.f32 %v1401_v28, %v1216_v6 }
 0xb8e   : > { %v1525_v30 = vpop.f32.mrf.mxu0 }
 0xb8f   : > { %1222 = vst [vmem:[%s342_s30] sm:$0xff] %v1217_v29 }
 0xb90   : > { %v1219_v31 = vpop.f32.mrf.mxu0 }
 0xb91   : > { %1779 = shalt.err (!%p1776_p9)
}
 0xb92   : > { %s1780_s4 = scalar_lea.hbm %s2185_s27, 128  ;;  %s1784_s7 = scalar_lea.hbm %s2239_s6, 256 }
 0xb93   : > { %p1781_p13 = scmp.ne.s32.totalorder %s2185_s27, %s1780_s4  ;;  %p1785_p5 = scmp.lt.s32.totalorder %s2185_s27, %s2239_s6 }
 0xb94   : > { %p1786_p10 = scmp.lt.s32.totalorder %s1784_s7, %s1780_s4 }
 0xb95   : > { %p1782_p12 = pnand %p1781_p13, %p2012_p6 }
 0xb96   : > { %p1787_p11 = por %p1786_p10, %p1785_p5 }
 0xb97   : > { %p1783_p0 = pneg %p1782_p12 }
 0xb99   : > { %p1788_p8 = pnand %p1787_p11, %p1783_p0 }
 0xb9b   : > { %1791 = shalt.err (!%p1788_p8)
}
 0xb9c   : > { %1541 = dma.vmem_to_hbm [thread:$0]  (%p2012_p6), %s2187_s10, 128, %s2185_s27, %s1224_s28   ;;  %v1526_v33 = vpop.f32.mrf.mxu0 }
 0xb9d PF: > { %s1250_s17 = sand.u32 1, %s1834_s21   ;;  %p2260_p3 = scmp.ne.s32.totalorder %s2249_s8, 0 }
 0xb9e   : > { %p2261_p2 = scmp.ge.s32.totalorder %s1854_s26, 2  ;;  %s1251_s18 = scalar_lea.sflag [#allocation5], %s1250_s17 }
 0xba0   : > { %p1558_p1 = pnand %p2261_p2, %p2260_p3 }
 0xba2   : > { %p1559_p4 = pneg %p1558_p1 }
 0xba4   : > { %1829 = dma.done.wait (%p1559_p4), %s1251_s18, 128  }
 0xba5   : > { %1831 = vsyncadd (%p1559_p4), %s1251_s18, 4294967168  ;;  %s24_s26 = sadd.s32 1, %s1854_s26   ;;  %s2262_s21 = smov %s1838_s22 }
 0xba6   : > { %p21_p7 = scmp.ge.s32.totalorder %s24_s26, 4   ;;  %s2263_s22 = smov %s1842_s23 }
 0xba7   : > { %s2264_s23 = smov %s2021_s13  ;;  %s2265_s24 = smov %s1850_s25 }
 0xba8   : > { %s2266_s25 = smov %s2268_s14  ;;  %23 = sbr.rel (!%p21_p7) target bundleno = 12 (0xc), region = 112 }
 0xbad   :  { %1256 = vsyncpa [#allocation4], 1 }
 0xbae   :  { %1258 = vsyncpa [#allocation4 + $0x1], 1 }
 0xbaf   :  { %1259 = vsyncpa [#allocation7], 1 }
 0xbb0   :  { %1260 = vsyncpa [#allocation10], 1 }
 0xbb1   :  { %1261 = vsyncpa [#allocation5], 1 }
 0xbb2   :  { %1263 = vsyncpa [#allocation5 + $0x1], 1 }

</bundles_post_ra>
